<compile_context>
chip_gen: v7x
topology: tpu7x:2x2x1
jax: 0.10.0
libtpu: 0.0.40
codegen_flags: <defaults>
</compile_context>

<pallas_src>
import functools

import jax
import jax.numpy as jnp
from jax.experimental import pallas as pl
from jax.experimental.pallas import tpu as pltpu

_LANES = 128
_SUBLANES = 8
_CHUNK_ROWS = 512      # rows per vreg-resident inner chunk (64 vregs per f32 temp)
_PAD_LOGIT = -30.0     # sentinel logit for tail padding: with target==0 the padded
                       # loss is ~6e-40, i.e. exactly 0 after the f32 reduction.


def _cdiv(a, b):
    return (a + b - 1) // b


def _round_up(a, b):
    return _cdiv(a, b) * b


def _varifocal_partial_kernel(pred_ref, tgt_ref, out_ref, *, alpha, gamma,
                              iou_weighted, chunk_rows, n_chunks):
    """Per-block varifocal loss accumulated into (8, 128) lane partials."""
    i = pl.program_id(1)   # inner ("arbitrary") reduction axis

    @pl.when(i == 0)
    def _():
        out_ref[...] = jnp.zeros_like(out_ref)

    def chunk_from(x_raw, t_raw, acc):
        x = x_raw.astype(jnp.float32)   # logits        (chunk_rows, 128)
        t = t_raw.astype(jnp.float32)   # iou targets

        # One shared exp per element feeds both sigmoid and the BCE log term.
        e = jnp.exp(-jnp.abs(x))                       # EUP
        inv = pl.reciprocal(1.0 + e, approx=True)      # EUP approx reciprocal
        p = jnp.where(x >= 0.0, inv, e * inv)          # exact-split sigmoid(x)

        d = p - t
        if float(gamma) == 2.0:
            mod = alpha * (d * d)                      # even power: pure VPU
        elif float(gamma) == float(int(gamma)) and 1 <= int(gamma) <= 4:
            ad = jnp.abs(d)
            m = ad
            for _ in range(int(gamma) - 1):            # repeated multiply, no pow
                m = m * ad
            mod = alpha * m
        else:
            mod = alpha * jnp.power(jnp.abs(d), gamma)  # generic fallback (log+exp)

        pos_w = t if iou_weighted else jnp.ones_like(t)
        focal_weight = jnp.where(t > 0.0, pos_w, mod)

        # Stable binary_cross_entropy_with_logits (reduction='none'), reusing e:
        #   max(x, 0) - x*t + log1p(exp(-|x|))
        bce = jnp.maximum(x, 0.0) - x * t + jnp.log1p(e)
        loss = bce * focal_weight

        # (chunk, 128) -> (chunk//8, 8, 128) sum over leading axis: VPU adds only.
        part = loss.reshape(chunk_rows // _SUBLANES, _SUBLANES, _LANES).sum(axis=0)
        return acc + part

    acc0 = jnp.zeros((_SUBLANES, _LANES), jnp.float32)
    if n_chunks == 1:
        acc = chunk_from(pred_ref[...], tgt_ref[...], acc0)
    else:
        def body(c, acc):
            r0 = pl.multiple_of(c * chunk_rows, chunk_rows)
            return chunk_from(pred_ref[pl.ds(r0, chunk_rows), :],
                              tgt_ref[pl.ds(r0, chunk_rows), :], acc)
        acc = jax.lax.fori_loop(0, n_chunks, body, acc0, unroll=True)

    out_ref[...] += acc.reshape(out_ref.shape)


def varifocal_loss(pred, target, *, weight=None, alpha=0.75, gamma=2.0,
                   iou_weighted=True, reduction='mean', loss_weight=1.0,
                   avg_factor=None, tile_rows=4096):
    """Pallas implementation of VarifocalLoss.forward (use_sigmoid=True).

    Accepts f32 or bf16 inputs of any shape; inputs are streamed at their native
    dtype (do NOT pre-cast bf16 -> f32 in the caller) and upcast to f32 inside
    the kernel.
    """
    assert pred.shape == target.shape
    if weight is not None:
        # TODO(synk): per-element `weight` needs a third streamed input; not wired.
        raise NotImplementedError("per-element weight not supported")
    if reduction == 'none':
        # TODO(synk): reduction='none' needs a separate elementwise (non-reducing) kernel.
        raise NotImplementedError("reduction='none' requires the elementwise variant")

    total = int(pred.size)
    rows = _cdiv(total, _LANES)

    # Balanced block sizing: fix the block count first, then split rows evenly so
    # tail padding stays below ~one chunk per block.
    nb_target = max(1, _cdiv(rows, int(tile_rows)))
    n_outer = 2 if nb_target >= 2 else 1        # >=2 lets megacore split the grid
    n_inner = _cdiv(nb_target, n_outer)
    n_blocks = n_outer * n_inner
    tm_req = _cdiv(rows, n_blocks)
    if tm_req >= _CHUNK_ROWS:
        chunk_rows = _CHUNK_ROWS
        tm = _round_up(tm_req, _CHUNK_ROWS)
    else:
        tm = _round_up(tm_req, _SUBLANES)
        chunk_rows = tm
    n_chunks = tm // chunk_rows
    rows_padded = n_blocks * tm
    pad = rows_padded * _LANES - total

    # Lane-dense (rows, 128) slab; keep the input dtype (bf16 passes through).
    flat_p = pred.reshape(-1)
    flat_t = target.reshape(-1)
    if pad:
        # Sentinel padding (large-negative logit, zero target) -> padded loss ~ 0,
        # so the kernel needs NO per-tile tail mask.
        # TODO(synk): for non-128-aligned totals this pad copy roughly doubles HBM
        # traffic; a (tm, C)-blocked 2-D variant would avoid the copy.
        flat_p = jnp.pad(flat_p, (0, pad), constant_values=_PAD_LOGIT)
        flat_t = jnp.pad(flat_t, (0, pad))
    p2 = flat_p.reshape(rows_padded, _LANES)
    t2 = flat_t.reshape(rows_padded, _LANES)

    kernel = functools.partial(
        _varifocal_partial_kernel,
        alpha=float(alpha),
        gamma=float(gamma),
        iou_weighted=bool(iou_weighted),
        chunk_rows=int(chunk_rows),
        n_chunks=int(n_chunks),
    )

    # Explicit VMEM budget: 2 pipeline buffers per input block + output blocks
    # + allowance for chunk-sized in-kernel temporaries / compiler scratch.
    in_buf_bytes = 2 * tm * _LANES * (p2.dtype.itemsize + t2.dtype.itemsize)
    out_buf_bytes = 2 * n_outer * _SUBLANES * _LANES * 4
    temp_bytes = 4 << 20
    vmem_limit = int(min(48 << 20,            # stay well under v7x's 64 MiB VMEM
                         max(16 << 20, in_buf_bytes + out_buf_bytes + temp_bytes)))

    partials = pl.pallas_call(
        kernel,
        out_shape=jax.ShapeDtypeStruct((n_outer, _SUBLANES, _LANES), jnp.float32),
        grid_spec=pltpu.PrefetchScalarGridSpec(
            num_scalar_prefetch=0,
            grid=(n_outer, n_inner),
            in_specs=[
                pl.BlockSpec((tm, _LANES), lambda o, i: (o * n_inner + i, 0)),
                pl.BlockSpec((tm, _LANES), lambda o, i: (o * n_inner + i, 0)),
            ],
            out_specs=pl.BlockSpec((1, _SUBLANES, _LANES), lambda o, i: (o, 0, 0)),
        ),
        compiler_params=pltpu.CompilerParams(
            dimension_semantics=("parallel", "arbitrary"),
            vmem_limit_bytes=vmem_limit,
        ),
    )(p2, t2)

    s = jnp.sum(partials)   # tiny (n_outer, 8, 128) finish-up reduce in JAX

    if avg_factor is None:
        out = s / jnp.float32(total) if reduction == 'mean' else s
    else:
        if reduction == 'mean':
            out = s / jnp.float32(avg_factor)
        else:
            raise ValueError('avg_factor can not be used with reduction="sum"')

    return jnp.float32(loss_weight) * out


def _reference_varifocal(pred, target, alpha=0.75, gamma=2.0, iou_weighted=True,
                         loss_weight=1.0, reduction='mean', avg_factor=None):
    """Plain-JAX reference matching the PyTorch module, for sanity checking."""
    pred = pred.astype(jnp.float32)
    target = target.astype(jnp.float32)
    p = jax.nn.sigmoid(pred)
    pos = (target > 0.0).astype(jnp.float32)
    neg = (target <= 0.0).astype(jnp.float32)
    base = target if iou_weighted else 1.0
    fw = base * pos + alpha * jnp.abs(p - target) ** gamma * neg
    bce = (jnp.maximum(pred, 0.0) - pred * target
           + jnp.log1p(jnp.exp(-jnp.abs(pred))))
    loss = bce * fw
    if avg_factor is not None:
        red = jnp.sum(loss) / avg_factor
    elif reduction == 'mean':
        red = jnp.mean(loss)
    else:
        red = jnp.sum(loss)
    return loss_weight * red


if __name__ == "__main__":
    key = jax.random.PRNGKey(0)
    ks = jax.random.split(key, 12)

    def make_case(kp, ki, km, shape, dtype=jnp.float32):
        pred = (jax.random.normal(kp, shape, dtype=jnp.float32) * 2.0).astype(dtype)
        iou = jax.random.uniform(ki, shape, dtype=jnp.float32)
        mask = (jax.random.uniform(km, shape) < 0.1).astype(jnp.float32)
        target = (iou * mask).astype(dtype)
        return pred, target

    def check(got, want, tol=1e-2):
        got = float(jax.block_until_ready(got))
        want = float(want)
        rel = abs(got - want) / max(abs(want), 1e-12)
        assert rel < tol, (got, want, rel)

    # 1) lane-aligned f32, mean (no pad path, single block / single chunk).
    p1, t1 = make_case(ks[0], ks[1], ks[2], (256, 128))
    check(varifocal_loss(p1, t1, reduction='mean'),
          _reference_varifocal(p1, t1, reduction='mean'))

    # 2) awkward shape (37, 80): sentinel-pad path, mean with avg_factor.
    p2a, t2a = make_case(ks[3], ks[4], ks[5], (37, 80))
    check(varifocal_loss(p2a, t2a, reduction='mean', avg_factor=57.0),
          _reference_varifocal(p2a, t2a, reduction='mean', avg_factor=57.0))

    # 3) bf16 pass-through, sum reduction, iou_weighted=False, integer gamma=3.
    p3, t3 = make_case(ks[6], ks[7], ks[8], (64, 80), dtype=jnp.bfloat16)
    check(varifocal_loss(p3, t3, reduction='sum', iou_weighted=False,
                         gamma=3.0, loss_weight=2.0),
          _reference_varifocal(p3, t3, reduction='sum', iou_weighted=False,
                               gamma=3.0, loss_weight=2.0))

    # 4) multi-block grid + unrolled chunk loop + inner-axis accumulation
    #    (small data, tile_rows lowered to force grid (2, 2) with 2 chunks/block).
    p4, t4 = make_case(ks[9], ks[10], ks[11], (4096, 128))
    check(varifocal_loss(p4, t4, reduction='mean', tile_rows=1024),
          _reference_varifocal(p4, t4, reduction='mean'))

    print("KERNEL_OK")
</pallas_src>

<mosaic_0001>
module attributes {stable_mosaic.version = 11 : i64} {
  func.func @_varifocal_partial_kernel(%arg0: i32, %arg1: i32, %arg2: memref<256x128xf32, #tpu.memory_space<vmem>>, %arg3: memref<256x128xf32, #tpu.memory_space<vmem>>, %arg4: memref<1x8x128xf32, #tpu.memory_space<vmem>>) attributes {dimension_semantics = [#tpu.dimension_semantics<parallel>, #tpu.dimension_semantics<arbitrary>], iteration_bounds = array<i64: 1, 1>, scalar_prefetch = 0 : i64, scratch_operands = 0 : i64, tpu.core_type = #tpu.core_type<tc>, window_params = [{transform_indices = @transform_0, window_bounds = array<i64: 256, 128>}, {transform_indices = @transform_1, window_bounds = array<i64: 256, 128>}, {transform_indices = @transform_2, window_bounds = array<i64: 1, 8, 128>}]} {
    %c0_i32 = arith.constant 0 : i32
    %0 = arith.cmpi eq, %arg1, %c0_i32 : i32
    %1 = arith.extui %0 : i1 to i32
    %c0_i32_0 = arith.constant 0 : i32
    %2 = arith.cmpi ne, %1, %c0_i32_0 : i32
    scf.if %2 {
      %cst_17 = arith.constant 0.000000e+00 : f32
      %38 = vector.broadcast %cst_17 : f32 to vector<1x8x128xf32>
      %c0_18 = arith.constant 0 : index
      %c0_19 = arith.constant 0 : index
      %c0_20 = arith.constant 0 : index
      %39 = vector.load %arg4[%c0_18, %c0_19, %c0_20] : memref<1x8x128xf32, #tpu.memory_space<vmem>>, vector<1x8x128xf32>
      tpu.vector_store %arg4[%c0_18, %c0_19, %c0_20], %38 {strides = array<i32>} : memref<1x8x128xf32, #tpu.memory_space<vmem>>, vector<1x8x128xf32>,
    } else {
    }
    %cst = arith.constant 0.000000e+00 : f32
    %3 = vector.broadcast %cst : f32 to vector<8x128xf32>
    %c0 = arith.constant 0 : index
    %c0_1 = arith.constant 0 : index
    %4 = vector.load %arg2[%c0, %c0_1] : memref<256x128xf32, #tpu.memory_space<vmem>>, vector<256x128xf32>
    %c0_2 = arith.constant 0 : index
    %c0_3 = arith.constant 0 : index
    %5 = vector.load %arg3[%c0_2, %c0_3] : memref<256x128xf32, #tpu.memory_space<vmem>>, vector<256x128xf32>
    %6 = math.absf %4 : vector<256x128xf32>
    %cst_4 = arith.constant 0.000000e+00 : f32
    %7 = vector.broadcast %cst_4 : f32 to vector<256x128xf32>
    %8 = arith.subf %7, %6 : vector<256x128xf32>
    %9 = math.exp %8 : vector<256x128xf32>
    %cst_5 = arith.constant 1.000000e+00 : f32
    %10 = vector.broadcast %cst_5 : f32 to vector<256x128xf32>
    %11 = arith.addf %10, %9 : vector<256x128xf32>
    %12 = tpu.reciprocal %11 {approx = true} : vector<256x128xf32> -> vector<256x128xf32>
    %cst_6 = arith.constant 0.000000e+00 : f32
    %13 = vector.broadcast %cst_6 : f32 to vector<256x128xf32>
    %14 = arith.cmpf oge, %4, %13 : vector<256x128xf32>
    %15 = arith.mulf %9, %12 : vector<256x128xf32>
    %16 = arith.select %14, %12, %15 : vector<256x128xi1>, vector<256x128xf32>
    %17 = arith.subf %16, %5 : vector<256x128xf32>
    %18 = arith.mulf %17, %17 : vector<256x128xf32>
    %cst_7 = arith.constant 7.500000e-01 : f32
    %19 = vector.broadcast %cst_7 : f32 to vector<256x128xf32>
    %20 = arith.mulf %19, %18 : vector<256x128xf32>
    %cst_8 = arith.constant 0.000000e+00 : f32
    %21 = vector.broadcast %cst_8 : f32 to vector<256x128xf32>
    %22 = arith.cmpf ogt, %5, %21 : vector<256x128xf32>
    %23 = arith.select %22, %5, %20 : vector<256x128xi1>, vector<256x128xf32>
    %cst_9 = arith.constant 0.000000e+00 : f32
    %24 = vector.broadcast %cst_9 : f32 to vector<256x128xf32>
    %25 = arith.maximumf %4, %24 : vector<256x128xf32>
    %26 = arith.mulf %4, %5 : vector<256x128xf32>
    %27 = arith.subf %25, %26 : vector<256x128xf32>
    %28 = math.log1p %9 : vector<256x128xf32>
    %29 = arith.addf %27, %28 : vector<256x128xf32>
    %30 = arith.mulf %29, %23 : vector<256x128xf32>
    %31 = vector.shape_cast %30 : vector<256x128xf32> to vector<32x8x128xf32>
    %cst_10 = arith.constant dense<0.000000e+00> : vector<8x128xf32>
    %32 = vector.multi_reduction <add>, %31, %cst_10 [0] : vector<32x8x128xf32> to vector<8x128xf32>
    %33 = arith.addf %3, %32 : vector<8x128xf32>
    %c0_11 = arith.constant 0 : index
    %c0_12 = arith.constant 0 : index
    %c0_13 = arith.constant 0 : index
    %34 = vector.load %arg4[%c0_11, %c0_12, %c0_13] : memref<1x8x128xf32, #tpu.memory_space<vmem>>, vector<1x8x128xf32>
    %35 = vector.shape_cast %33 : vector<8x128xf32> to vector<1x8x128xf32>
    %36 = arith.addf %34, %35 : vector<1x8x128xf32>
    %c0_14 = arith.constant 0 : index
    %c0_15 = arith.constant 0 : index
    %c0_16 = arith.constant 0 : index
    %37 = vector.load %arg4[%c0_14, %c0_15, %c0_16] : memref<1x8x128xf32, #tpu.memory_space<vmem>>, vector<1x8x128xf32>
    tpu.vector_store %arg4[%c0_14, %c0_15, %c0_16], %36 {strides = array<i32>} : memref<1x8x128xf32, #tpu.memory_space<vmem>>, vector<1x8x128xf32>,
    return
  }
  func.func @transform_0(%arg0: i32, %arg1: i32) -> (i32, i32) {
    %c1_i32 = arith.constant 1 : i32
    %0 = arith.muli %arg0, %c1_i32 : i32
    %1 = arith.addi %0, %arg1 : i32
    %c0_i32 = arith.constant 0 : i32
    %c0_i32_0 = arith.constant 0 : i32
    return %1, %c0_i32 : i32, i32
  }
  func.func @transform_1(%arg0: i32, %arg1: i32) -> (i32, i32) {
    %c1_i32 = arith.constant 1 : i32
    %0 = arith.muli %arg0, %c1_i32 : i32
    %1 = arith.addi %0, %arg1 : i32
    %c0_i32 = arith.constant 0 : i32
    %c0_i32_0 = arith.constant 0 : i32
    return %1, %c0_i32 : i32, i32
  }
  func.func @transform_2(%arg0: i32, %arg1: i32) -> (i32, i32, i32) {
    %c0_i32 = arith.constant 0 : i32
    %c0_i32_0 = arith.constant 0 : i32
    %c0_i32_1 = arith.constant 0 : i32
    return %arg0, %c0_i32, %c0_i32_0 : i32, i32, i32
  }
}

</mosaic_0001>

<bundles_post_ra>
// kernel: tpu_custom_call.1
= control target key start
LH: loop header
LB: loop body
LE: loop exit
PB: predicated region body
PF: predicated region fallthrough
CT: control target
= control target key end

     0   :  { %7 = vsyncpa [#allocation3], 0  ;;  %s3051_s0 = inlined_call_operand.hbm [shape: f32[256,128], index: 0, kind: input, shape index: {}]   ;;  %s3052_s1 = inlined_call_operand.hbm [shape: f32[256,128], index: 1, kind: input, shape index: {}]   ;;  %s3053_s2 = inlined_call_operand.hbm [shape: f32[1,8,128], index: 2, kind: output, shape index: {}]  }
   0x1   :  { %8 = vsyncpa [#allocation6], 0 }
   0x2   :  { %9 = vsyncpa [#allocation4], 0  ;;  %s1359_s9 = smov [#allocation2]   ;;  %s1287_s13 = scalar_lea.hbm %s3051_s0, 4096 }
   0x3   :  { %s19_s10 = sshll.u32 %s1359_s9, 4  ;;  %p1288_p0 = scmp.ne.s32.totalorder %s3051_s0, %s1287_s13  ;;  %s20_s10 = int_to_ptr.vmem [resolvable:$true] %s19_s10 }
   0x4   :  { %p1291_p1 = scmp.lt.u32.totalorder %s1287_s13, %s3051_s0 }
   0x6   :  { %p1293_p2 = pnand %p1291_p1, %p1288_p0 }
   0x8   :  { %1296 = shalt.err (!%p1293_p2)
}
   0x9   :  { %s1297_s18 = scalar_lea.vmem %s20_s10, 4096  ;;  %p1302_p4 = scmp.lt.s32.totalorder %s20_s10, %s20_s10 }
   0xa   :  { %p1298_p3 = scmp.ne.s32.totalorder %s20_s10, %s1297_s18  ;;  %p1303_p5 = scmp.lt.s32.totalorder %s1297_s18, %s1297_s18 }
   0xc   :  { %p1304_p6 = por %p1303_p5, %p1302_p4 }
   0xe   :  { %p1305_p7 = pnand %p1304_p6, %p1298_p3 }
  0x10   :  { %1308 = shalt.err (!%p1305_p7)
}
  0x11   :  { %s1360_s19 = smov 128   ;;  %s1361_s20 = smov 8  }
  0x12   :  { %25 = dma.hbm_to_vmem [thread:$0]  %s3051_s0, 4096, %s20_s10, [#allocation3], %s1360_s19, %s1360_s19, %s1361_s20  }
  0x13   :  { %s1362_s23 = smov [#allocation5]   ;;  %s1309_s27 = scalar_lea.hbm %s3052_s1, 4096 }
  0x14   :  { %s35_s24 = sshll.u32 %s1362_s23, 4  ;;  %p1310_p8 = scmp.ne.s32.totalorder %s3052_s1, %s1309_s27  ;;  %s36_s24 = int_to_ptr.vmem [resolvable:$true] %s35_s24 }
  0x15   :  { %p1313_p9 = scmp.lt.u32.totalorder %s1309_s27, %s3052_s1 }
  0x17   :  { %p1315_p10 = pnand %p1313_p9, %p1310_p8 }
  0x19   :  { %1318 = shalt.err (!%p1315_p10)
}
  0x1a   :  { %s1319_s4 = scalar_lea.vmem %s36_s24, 4096  ;;  %p1324_p12 = scmp.lt.s32.totalorder %s36_s24, %s36_s24 }
  0x1b   :  { %p1320_p11 = scmp.ne.s32.totalorder %s36_s24, %s1319_s4  ;;  %p1325_p13 = scmp.lt.s32.totalorder %s1319_s4, %s1319_s4 }
  0x1d   :  { %p1326_p0 = por %p1325_p13, %p1324_p12 }
  0x1f   :  { %p1327_p1 = pnand %p1326_p0, %p1320_p11 }
  0x21   :  { %1330 = shalt.err (!%p1327_p1)
}
  0x22   :  { %41 = dma.hbm_to_vmem [thread:$0]  %s3052_s1, 4096, %s36_s24, [#allocation6], %s1360_s19, %s1360_s19, %s1361_s20  }
  0x23   :  { %1353 = dma.done.wait [#allocation3], 4096  }
  0x24   :  { %1354 = vsyncadd [#allocation3], 4294963200 }
  0x25   :  { %1355 = dma.done.wait [#allocation6], 4096  }
  0x26   :  { %1356 = vsyncadd [#allocation6], 4294963200  ;;  %v1403_v0 = vld [vmem:[#allocation2] sm:$0xff]  ;;  %v1405_v1 = vld [vmem:[#allocation2 + $0x8] sm:$0xff]  ;;  %s1363_s1 = smov [#allocation7]  }
  0x27   :  { %3250 = vst [vmem:[#allocation11_spill] sm:$0xff] %v1403_v0  ;;  %3251 = vst [vmem:[#allocation12_spill] sm:$0xff] %v1405_v1  ;;  %v1407_v2 = vld [vmem:[#allocation2 + $0x10] sm:$0xff]  ;;  %v1409_v3 = vld [vmem:[#allocation2 + $0x18] sm:$0xff]  ;;  %v121_v4 = vand.u32 2147483647, %v1403_v0 }
  0x28   :  { %3252 = vst [vmem:[#allocation13_spill] sm:$0xff] %v1407_v2  ;;  %3253 = vst [vmem:[#allocation14_spill] sm:$0xff] %v1409_v3  ;;  %v1412_v5 = vld [vmem:[#allocation2 + $0x20] sm:$0xff]  ;;  %v122_v6 = vand.u32 2147483647, %v1405_v1  ;;  %v1415_v7 = vld [vmem:[#allocation2 + $0x28] sm:$0xff] }
  0x29   :  { %3254 = vst [vmem:[#allocation15_spill] sm:$0xff] %v1412_v5  ;;  %3255 = vst [vmem:[#allocation16_spill] sm:$0xff] %v1415_v7  ;;  %v123_v8 = vand.u32 2147483647, %v1407_v2  ;;  %v1418_v9 = vld [vmem:[#allocation2 + $0x30] sm:$0xff]  ;;  %v1421_v11 = vld [vmem:[#allocation2 + $0x38] sm:$0xff] }
  0x2a   :  { %3256 = vst [vmem:[#allocation17_spill] sm:$0xff] %v1418_v9  ;;  %v124_v10 = vand.u32 2147483647, %v1409_v3  ;;  %3257 = vst [vmem:[#allocation18_spill] sm:$0xff] %v1421_v11  ;;  %v125_v12 = vand.u32 2147483647, %v1412_v5 }
  0x2b   :  { %v153_v13 = vsub.f32 0.0, %v121_v4  ;;  %v1424_v14 = vld [vmem:[#allocation2 + $0x40] sm:$0xff]  ;;  %v126_v15 = vand.u32 2147483647, %v1415_v7  ;;  %v154_v16 = vsub.f32 0.0, %v122_v6  ;;  %v1427_v17 = vld [vmem:[#allocation2 + $0x48] sm:$0xff] }
  0x2c   :  { %3258 = vst [vmem:[#allocation19_spill] sm:$0xff] %v1424_v14  ;;  %3259 = vst [vmem:[#allocation20_spill] sm:$0xff] %v1427_v17  ;;  %v127_v18 = vand.u32 2147483647, %v1418_v9  ;;  %v155_v19 = vsub.f32 0.0, %v123_v8  ;;  %v1430_v20 = vld [vmem:[#allocation2 + $0x50] sm:$0xff] }
  0x2d   :  { %3260 = vst [vmem:[#allocation21_spill] sm:$0xff] %v1430_v20  ;;  %v128_v21 = vand.u32 2147483647, %v1421_v11  ;;  %v156_v22 = vsub.f32 0.0, %v124_v10  ;;  %v1433_v23 = vld [vmem:[#allocation2 + $0x58] sm:$0xff]  ;;  %v157_v25 = vsub.f32 0.0, %v125_v12 }
  0x2e   :  { %3261 = vst [vmem:[#allocation22_spill] sm:$0xff] %v1433_v23  ;;  %v129_v24 = vand.u32 2147483647, %v1424_v14  ;;  %v185_v26 = vmul.f32 1.442695, %v153_v13  ;;  %v1436_v27 = vld [vmem:[#allocation2 + $0x60] sm:$0xff] }
  0x2f   :  { %3262 = vst [vmem:[#allocation23_spill] sm:$0xff] %v1436_v27  ;;  %v130_v28 = vand.u32 2147483647, %v1427_v17  ;;  %v158_v29 = vsub.f32 0.0, %v126_v15  ;;  %v187_v30 = vmul.f32 1.442695, %v154_v16 }
  0x30   :  { %v1439_v31 = vld [vmem:[#allocation2 + $0x68] sm:$0xff]  ;;  %v131_v32 = vand.u32 2147483647, %v1430_v20  ;;  %v159_v33 = vsub.f32 0.0, %v127_v18  ;;  %v189_v34 = vmul.f32 1.442695, %v155_v19  ;;  %1074 = vpow2.f32 %v185_v26 }
  0x31   :  { %v1442_v35 = vld [vmem:[#allocation2 + $0x70] sm:$0xff]  ;;  %v132_v36 = vand.u32 2147483647, %v1433_v23  ;;  %v160_v37 = vsub.f32 0.0, %v128_v21  ;;  %v191_v38 = vmul.f32 1.442695, %v156_v22  ;;  %1076 = vpow2.f32 %v187_v30 }
  0x32   :  { %v1445_v39 = vld [vmem:[#allocation2 + $0x78] sm:$0xff]  ;;  %v133_v40 = vand.u32 2147483647, %v1436_v27  ;;  %v161_v41 = vsub.f32 0.0, %v129_v24  ;;  %v193_v42 = vmul.f32 1.442695, %v157_v25  ;;  %1078 = vpow2.f32 %v189_v34 }
  0x33   :  { %v1448_v43 = vld [vmem:[#allocation2 + $0x80] sm:$0xff]  ;;  %v134_v44 = vand.u32 2147483647, %v1439_v31  ;;  %v162_v45 = vsub.f32 0.0, %v130_v28  ;;  %v195_v46 = vmul.f32 1.442695, %v158_v29  ;;  %1080 = vpow2.f32 %v191_v38 }
  0x34   :  { %v1451_v47 = vld [vmem:[#allocation2 + $0x88] sm:$0xff]  ;;  %v135_v48 = vand.u32 2147483647, %v1442_v35  ;;  %v163_v49 = vsub.f32 0.0, %v131_v32  ;;  %v197_v50 = vmul.f32 1.442695, %v159_v33  ;;  %1082 = vpow2.f32 %v193_v42 }
  0x35   :  { %v1454_v51 = vld [vmem:[#allocation2 + $0x90] sm:$0xff]  ;;  %v136_v52 = vand.u32 2147483647, %v1445_v39  ;;  %v164_v53 = vsub.f32 0.0, %v132_v36  ;;  %v199_v54 = vmul.f32 1.442695, %v160_v37  ;;  %1084 = vpow2.f32 %v195_v46 }
  0x36   :  { %v1457_v55 = vld [vmem:[#allocation2 + $0x98] sm:$0xff]  ;;  %v137_v56 = vand.u32 2147483647, %v1448_v43  ;;  %v165_v57 = vsub.f32 0.0, %v133_v40  ;;  %v201_v58 = vmul.f32 1.442695, %v161_v41  ;;  %1086 = vpow2.f32 %v197_v50 }
  0x37   :  { %v1460_v59 = vld [vmem:[#allocation2 + $0xa0] sm:$0xff]  ;;  %v138_v60 = vand.u32 2147483647, %v1451_v47  ;;  %v166_v61 = vsub.f32 0.0, %v134_v44  ;;  %v203_v62 = vmul.f32 1.442695, %v162_v45  ;;  %1088 = vpow2.f32 %v199_v54 }
  0x38   :  { %v1463_v63 = vld [vmem:[#allocation2 + $0xa8] sm:$0xff]  ;;  %v139_v4 = vand.u32 2147483647, %v1454_v51  ;;  %v167_v6 = vsub.f32 0.0, %v135_v48  ;;  %v205_v8 = vmul.f32 1.442695, %v163_v49  ;;  %1090 = vpow2.f32 %v201_v58 }
  0x39   :  { %v1466_v10 = vld [vmem:[#allocation2 + $0xb0] sm:$0xff]  ;;  %v140_v12 = vand.u32 2147483647, %v1457_v55  ;;  %v168_v13 = vsub.f32 0.0, %v136_v52  ;;  %v207_v15 = vmul.f32 1.442695, %v164_v53  ;;  %1092 = vpow2.f32 %v203_v62 }
  0x3a   :  { %v1469_v16 = vld [vmem:[#allocation2 + $0xb8] sm:$0xff]  ;;  %v141_v18 = vand.u32 2147483647, %v1460_v59  ;;  %v169_v19 = vsub.f32 0.0, %v137_v56  ;;  %v209_v21 = vmul.f32 1.442695, %v165_v57  ;;  %v1475_v28 = vpop.eup %1074  ;;  %1094 = vpow2.f32 %v205_v8 }
  0x3b   :  { %v1472_v22 = vld [vmem:[#allocation2 + $0xc0] sm:$0xff]  ;;  %v142_v24 = vand.u32 2147483647, %v1463_v63  ;;  %v170_v25 = vsub.f32 0.0, %v138_v60  ;;  %v211_v26 = vmul.f32 1.442695, %v166_v61  ;;  %v1480_v34 = vpop.eup %1076  ;;  %1096 = vpow2.f32 %v207_v15 }
  0x3c   :  { %3263 = vst [vmem:[#allocation24_spill] sm:$0xff] %v1472_v22  ;;  %3264 = vst [vmem:[#allocation25_spill] sm:$0xff] %v1475_v28  ;;  %v1477_v29 = vld [vmem:[#allocation2 + $0xc8] sm:$0xff]  ;;  %v143_v30 = vand.u32 2147483647, %v1466_v10  ;;  %v171_v32 = vsub.f32 0.0, %v139_v4  ;;  %v1485_v41 = vpop.eup %1078  ;;  %1098 = vpow2.f32 %v209_v21 }
  0x3d   :  { %3265 = vst [vmem:[#allocation26_spill] sm:$0xff] %v1477_v29  ;;  %v213_v33 = vmul.f32 1.442695, %v167_v6  ;;  %3266 = vst [vmem:[#allocation27_spill] sm:$0xff] %v1480_v34  ;;  %v1482_v36 = vld [vmem:[#allocation2 + $0xd0] sm:$0xff]  ;;  %v172_v38 = vsub.f32 0.0, %v140_v12  ;;  %v1490_v48 = vpop.eup %1080  ;;  %1100 = vpow2.f32 %v211_v26 }
  0x3e   :  { %3267 = vst [vmem:[#allocation28_spill] sm:$0xff] %v1482_v36  ;;  %v144_v37 = vand.u32 2147483647, %v1469_v16  ;;  %v215_v40 = vmul.f32 1.442695, %v168_v13  ;;  %3268 = vst [vmem:[#allocation29_spill] sm:$0xff] %v1485_v41  ;;  %v1495_v54 = vpop.eup %1082 }
  0x3f   :  { %v1487_v42 = vld [vmem:[#allocation2 + $0xd8] sm:$0xff]  ;;  %v145_v44 = vand.u32 2147483647, %v1472_v22  ;;  %v173_v45 = vsub.f32 0.0, %v141_v18  ;;  %v217_v46 = vmul.f32 1.442695, %v169_v19  ;;  %1102 = vpow2.f32 %v213_v33  ;;  %v1500_v61 = vpop.eup %1084 }
  0x40   :  { %3269 = vst [vmem:[#allocation30_spill] sm:$0xff] %v1487_v42  ;;  %3270 = vst [vmem:[#allocation31_spill] sm:$0xff] %v1490_v48  ;;  %v1492_v49 = vld [vmem:[#allocation2 + $0xe0] sm:$0xff]  ;;  %v146_v50 = vand.u32 2147483647, %v1477_v29  ;;  %v174_v52 = vsub.f32 0.0, %v142_v24  ;;  %1104 = vpow2.f32 %v215_v40  ;;  %v1505_v12 = vpop.eup %1086 }
  0x41   :  { %3271 = vst [vmem:[#allocation32_spill] sm:$0xff] %v1492_v49  ;;  %v219_v53 = vmul.f32 1.442695, %v170_v25  ;;  %3272 = vst [vmem:[#allocation33_spill] sm:$0xff] %v1495_v54  ;;  %v1497_v56 = vld [vmem:[#allocation2 + $0xe8] sm:$0xff]  ;;  %v175_v58 = vsub.f32 0.0, %v143_v30  ;;  %1106 = vpow2.f32 %v217_v46  ;;  %v1510_v21 = vpop.eup %1088 }
  0x42   :  { %3273 = vst [vmem:[#allocation34_spill] sm:$0xff] %v1497_v56  ;;  %v147_v57 = vand.u32 2147483647, %v1482_v36  ;;  %v221_v60 = vmul.f32 1.442695, %v171_v32  ;;  %3274 = vst [vmem:[#allocation35_spill] sm:$0xff] %v1500_v61  ;;  %v1513_v30 = vpop.eup %1090 }
  0x43   :  { %v1502_v62 = vld [vmem:[#allocation2 + $0xf0] sm:$0xff]  ;;  %v148_v4 = vand.u32 2147483647, %v1487_v42  ;;  %v176_v6 = vsub.f32 0.0, %v144_v37  ;;  %v223_v8 = vmul.f32 1.442695, %v172_v38  ;;  %1108 = vpow2.f32 %v219_v53  ;;  %v1516_v38 = vpop.eup %1092 }
  0x44   :  { %3275 = vst [vmem:[#allocation36_spill] sm:$0xff] %v1502_v62  ;;  %3276 = vst [vmem:[#allocation37_spill] sm:$0xff] %v1505_v12  ;;  %v1507_v13 = vld [vmem:[#allocation2 + $0xf8] sm:$0xff]  ;;  %v149_v15 = vand.u32 2147483647, %v1492_v49  ;;  %v177_v18 = vsub.f32 0.0, %v145_v44  ;;  %1110 = vpow2.f32 %v221_v60  ;;  %v1519_v46 = vpop.eup %1094 }
  0x45   :  { %3277 = vst [vmem:[#allocation38_spill] sm:$0xff] %v1507_v13  ;;  %v225_v19 = vmul.f32 1.442695, %v173_v45  ;;  %3278 = vst [vmem:[#allocation39_spill] sm:$0xff] %v1510_v21  ;;  %v150_v24 = vand.u32 2147483647, %v1497_v56  ;;  %1112 = vpow2.f32 %v223_v8 }
  0x46   :  { %v178_v25 = vsub.f32 0.0, %v146_v50  ;;  %v227_v26 = vmul.f32 1.442695, %v174_v52  ;;  %3279 = vst [vmem:[#allocation40_spill] sm:$0xff] %v1513_v30  ;;  %v151_v32 = vand.u32 2147483647, %v1502_v62  ;;  %v1521_v52 = vpop.eup %1096 }
  0x47   :  { %v179_v33 = vsub.f32 0.0, %v147_v57  ;;  %v229_v37 = vmul.f32 1.442695, %v175_v58  ;;  %3280 = vst [vmem:[#allocation41_spill] sm:$0xff] %v1516_v38  ;;  %v152_v40 = vand.u32 2147483647, %v1507_v13  ;;  %1114 = vpow2.f32 %v225_v19  ;;  %v1523_v57 = vpop.eup %1098 }
  0x48   :  { %v180_v44 = vsub.f32 0.0, %v148_v4  ;;  %v231_v45 = vmul.f32 1.442695, %v176_v6  ;;  %3281 = vst [vmem:[#allocation42_spill] sm:$0xff] %v1519_v46  ;;  %v181_v56 = vsub.f32 0.0, %v149_v15  ;;  %3282 = vst [vmem:[#allocation43_spill] sm:$0xff] %v1521_v52  ;;  %1116 = vpow2.f32 %v227_v26  ;;  %v1525_v49 = vpop.eup %1100 }
  0x49   :  { %v233_v50 = vmul.f32 1.442695, %v177_v18  ;;  %v182_v53 = vsub.f32 0.0, %v150_v24  ;;  %v235_v62 = vmul.f32 1.442695, %v178_v25  ;;  %3283 = vst [vmem:[#allocation44_spill] sm:$0xff] %v1523_v57  ;;  %1118 = vpow2.f32 %v229_v37  ;;  %v1527_v8 = vpop.eup %1102 }
  0x4a   :  { %v183_v58 = vsub.f32 0.0, %v151_v32  ;;  %v237_v60 = vmul.f32 1.442695, %v179_v33  ;;  %3284 = vst [vmem:[#allocation45_spill] sm:$0xff] %v1525_v49  ;;  %v184_v4 = vsub.f32 0.0, %v152_v40  ;;  %1120 = vpow2.f32 %v231_v45  ;;  %3285 = vst [vmem:[#allocation46_spill] sm:$0xff] %v1527_v8  ;;  %v1529_v18 = vpop.eup %1104 }
  0x4b   :  { %v239_v6 = vmul.f32 1.442695, %v180_v44  ;;  %1122 = vpow2.f32 %v233_v50  ;;  %v241_v15 = vmul.f32 1.442695, %v181_v56  ;;  %3286 = vst [vmem:[#allocation47_spill] sm:$0xff] %v1529_v18  ;;  %v1531_v24 = vpop.eup %1106  ;;  %v1537_v37 = vld [vmem:[#allocation5] sm:$0xff] }
  0x4c   :  { %1124 = vpow2.f32 %v235_v62  ;;  %v243_v19 = vmul.f32 1.442695, %v182_v53  ;;  %3287 = vst [vmem:[#allocation48_spill] sm:$0xff] %v1531_v24  ;;  %v245_v25 = vmul.f32 1.442695, %v183_v58  ;;  %3290 = vst [vmem:[#allocation51_spill] sm:$0xff] %v1537_v37  ;;  %v1573_v42 = vmul.f32 %v1537_v37, %v1403_v0 }
  0x4d   :  { %1126 = vpow2.f32 %v237_v60  ;;  %v1533_v26 = vpop.eup %1108  ;;  %v247_v32 = vmul.f32 1.442695, %v184_v4  ;;  %v1539_v40 = vld [vmem:[#allocation5 + $0x8] sm:$0xff]  ;;  %v1542_v56 = vadd.f32 1.0, %v1475_v28  ;;  %v1546_v44 = vld [vmem:[#allocation5 + $0x10] sm:$0xff]  ;;  %v1548_v45 = vld [vmem:[#allocation5 + $0x18] sm:$0xff] }
  0x4e   :  { %3288 = vst [vmem:[#allocation49_spill] sm:$0xff] %v1533_v26  ;;  %1128 = vpow2.f32 %v239_v6  ;;  %v1535_v33 = vpop.eup %1110  ;;  %3291 = vst [vmem:[#allocation52_spill] sm:$0xff] %v1539_v40  ;;  %v1551_v50 = vadd.f32 1.0, %v1480_v34  ;;  %v1555_v58 = vld [vmem:[#allocation5 + $0x20] sm:$0xff]  ;;  %v1557_v60 = vld [vmem:[#allocation5 + $0x28] sm:$0xff]  ;;  %v1560_v4 = vadd.f32 1.0, %v1485_v41 }
  0x4f   :  { %3289 = vst [vmem:[#allocation50_spill] sm:$0xff] %v1535_v33  ;;  %1130 = vpow2.f32 %v241_v15  ;;  %3292 = vst [vmem:[#allocation53_spill] sm:$0xff] %v1542_v56  ;;  %v1544_v62 = vpop.eup %1112  ;;  %v1564_v15 = vld [vmem:[#allocation5 + $0x30] sm:$0xff]  ;;  %v1566_v13 = vld [vmem:[#allocation5 + $0x38] sm:$0xff]  ;;  %v1586_v41 = vadd.f32 1.0, %v1495_v54  ;;  %v1622_v54 = vadd.f32 1.0, %v1505_v12 }
  0x50   :  { %3293 = vst [vmem:[#allocation54_spill] sm:$0xff] %v1544_v62  ;;  %3294 = vst [vmem:[#allocation55_spill] sm:$0xff] %v1546_v44  ;;  %1132 = vpow2.f32 %v243_v19  ;;  %v1569_v19 = vadd.f32 1.0, %v1490_v48  ;;  %v1581_v29 = vld [vmem:[#allocation5 + $0x40] sm:$0xff]  ;;  %v1583_v22 = vld [vmem:[#allocation5 + $0x48] sm:$0xff]  ;;  %v1604_v48 = vadd.f32 1.0, %v1500_v61 }
  0x51   :  { %3295 = vst [vmem:[#allocation56_spill] sm:$0xff] %v1548_v45  ;;  %3296 = vst [vmem:[#allocation57_spill] sm:$0xff] %v1551_v50  ;;  %v1553_v53 = vpop.eup %1114  ;;  %1134 = vpow2.f32 %v245_v25  ;;  %v1577_v25 = vmul.f32 %v1539_v40, %v1405_v1  ;;  %v1599_v40 = vld [vmem:[#allocation5 + $0x50] sm:$0xff]  ;;  %v1601_v37 = vld [vmem:[#allocation5 + $0x58] sm:$0xff]  ;;  %v1640_v61 = vadd.f32 1.0, %v1510_v21  ;;  %v1658_v12 = vadd.f32 1.0, %v1513_v30 }
  0x52   :  { %3297 = vst [vmem:[#allocation58_spill] sm:$0xff] %v1553_v53  ;;  %3298 = vst [vmem:[#allocation59_spill] sm:$0xff] %v1555_v58  ;;  %v1562_v6 = vpop.eup %1116  ;;  %1136 = vpow2.f32 %v247_v32  ;;  %v1591_v32 = vmul.f32 %v1546_v44, %v1407_v2  ;;  %v1619_v44 = vld [vmem:[#allocation5 + $0x68] sm:$0xff]  ;;  %v1676_v21 = vadd.f32 1.0, %v1516_v38  ;;  %v1694_v30 = vadd.f32 1.0, %v1519_v46  ;;  %s1058_s6 = sshll.u32 %s1363_s1, 4  ;;  %s1059_s6 = int_to_ptr.vmem [resolvable:$true] %s1058_s6 }
  0x53   :  { %3299 = vst [vmem:[#allocation60_spill] sm:$0xff] %v1557_v60  ;;  %3300 = vst [vmem:[#allocation61_spill] sm:$0xff] %v1560_v4  ;;  %v1579_v36 = vpop.eup %1118  ;;  %1138 = vrcp.f32 %v1542_v56  ;;  %v1609_v56 = vmul.f32 %v1555_v58, %v1412_v5  ;;  %v1637_v58 = vld [vmem:[#allocation5 + $0x78] sm:$0xff]  ;;  %v1712_v38 = vadd.f32 1.0, %v1521_v52  ;;  %vm313_vm0 = vcmp.ge.f32.partialorder %v1403_v0, 0.0  ;;  %v3408_v0 = vld [vmem:[#allocation28_spill] sm:$0xff]  ;;  %p1336_p3 = scmp.lt.s32.totalorder %s1059_s6, %s1059_s6 }
  0x54   :  { %3301 = vst [vmem:[#allocation62_spill] sm:$0xff] %v1562_v6  ;;  %3302 = vst [vmem:[#allocation63_spill] sm:$0xff] %v1564_v15  ;;  %1140 = vrcp.f32 %v1551_v50  ;;  %v1627_v50 = vmul.f32 %v1564_v15, %v1418_v9  ;;  %v1655_v15 = vld [vmem:[#allocation5 + $0x88] sm:$0xff]  ;;  %vm314_vm1 = vcmp.ge.f32.partialorder %v1405_v1, 0.0  ;;  %vm315_vm2 = vcmp.ge.f32.partialorder %v1407_v2, 0.0  ;;  %s1331_s7 = scalar_lea.vmem %s1059_s6, 128 }
  0x55   :  { %3303 = vst [vmem:[#allocation64_spill] sm:$0xff] %v1566_v13  ;;  %3304 = vst [vmem:[#allocation65_spill] sm:$0xff] %v1569_v19  ;;  %1142 = vrcp.f32 %v1560_v4  ;;  %v1645_v4 = vmul.f32 %v1581_v29, %v1424_v14  ;;  %vm316_vm3 = vcmp.ge.f32.partialorder %v1409_v3, 0.0  ;;  %vm317_vm4 = vcmp.ge.f32.partialorder %v1412_v5, 0.0  ;;  %p1332_p2 = scmp.ne.s32.totalorder %s1059_s6, %s1331_s7  ;;  %p1337_p4 = scmp.lt.s32.totalorder %s1331_s7, %s1331_s7 }
  0x56   :  { %3305 = vst [vmem:[#allocation66_spill] sm:$0xff] %v1573_v42  ;;  %3306 = vst [vmem:[#allocation67_spill] sm:$0xff] %v1577_v25  ;;  %v1595_v42 = vmul.f32 %v1548_v45, %v1409_v3  ;;  %v1597_v25 = vpop.eup %1120  ;;  %v1617_v45 = vld [vmem:[#allocation5 + $0x60] sm:$0xff]  ;;  %1144 = vrcp.f32 %v1569_v19  ;;  %v1663_v19 = vmul.f32 %v1599_v40, %v1430_v20  ;;  %vm318_vm5 = vcmp.ge.f32.partialorder %v1415_v7, 0.0 }
  0x57   :  { %3307 = vst [vmem:[#allocation68_spill] sm:$0xff] %v1579_v36  ;;  %3308 = vst [vmem:[#allocation69_spill] sm:$0xff] %v1581_v29  ;;  %1146 = vrcp.f32 %v1586_v41  ;;  %v1673_v29 = vld [vmem:[#allocation5 + $0x98] sm:$0xff]  ;;  %vm319_vm6 = vcmp.ge.f32.partialorder %v1418_v9, 0.0  ;;  %vm320_vm7 = vcmp.ge.f32.partialorder %v1421_v11, 0.0  ;;  %vm321_vm8 = vcmp.ge.f32.partialorder %v1424_v14, 0.0  ;;  %p1338_p5 = por %p1337_p4, %p1336_p3 }
  0x58   :  { %3309 = vst [vmem:[#allocation70_spill] sm:$0xff] %v1583_v22  ;;  %3310 = vst [vmem:[#allocation71_spill] sm:$0xff] %v1586_v41  ;;  %1148 = vrcp.f32 %v1604_v48  ;;  %v1681_v41 = vmul.f32 %v1617_v45, %v1436_v27  ;;  %vm322_vm9 = vcmp.ge.f32.partialorder %v1427_v17, 0.0  ;;  %vm323_vm10 = vcmp.ge.f32.partialorder %v1430_v20, 0.0  ;;  %v3401_v20 = vld [vmem:[#allocation50_spill] sm:$0xff] }
  0x59   :  { %3311 = vst [vmem:[#allocation72_spill] sm:$0xff] %v1591_v32  ;;  %3312 = vst [vmem:[#allocation73_spill] sm:$0xff] %v1595_v42  ;;  %v1613_v32 = vmul.f32 %v1557_v60, %v1415_v7  ;;  %v1615_v42 = vpop.eup %1122  ;;  %v1635_v60 = vld [vmem:[#allocation5 + $0x70] sm:$0xff]  ;;  %1150 = vrcp.f32 %v1622_v54  ;;  %vm324_vm11 = vcmp.ge.f32.partialorder %v1433_v23, 0.0  ;;  %vm325_vm12 = vcmp.ge.f32.partialorder %v1436_v27, 0.0  ;;  %v3405_v7 = vld [vmem:[#allocation54_spill] sm:$0xff]  ;;  %p1339_p6 = pnand %p1338_p5, %p1332_p2 }
  0x5a   :  { %3313 = vst [vmem:[#allocation74_spill] sm:$0xff] %v1597_v25  ;;  %3314 = vst [vmem:[#allocation75_spill] sm:$0xff] %v1599_v40  ;;  %v1691_v40 = vld [vmem:[#allocation5 + $0xa8] sm:$0xff]  ;;  %1152 = vrcp.f32 %v1640_v61  ;;  %vm326_vm13 = vcmp.ge.f32.partialorder %v1439_v31, 0.0  ;;  %vm327_vm14 = vcmp.ge.f32.partialorder %v1442_v35, 0.0  ;;  %vm328_vm15 = vcmp.ge.f32.partialorder %v1445_v39, 0.0 }
  0x5b   :  { %3315 = vst [vmem:[#allocation76_spill] sm:$0xff] %v1601_v37  ;;  %3316 = vst [vmem:[#allocation77_spill] sm:$0xff] %v1604_v48  ;;  %v1699_v48 = vmul.f32 %v1635_v60, %v1442_v35  ;;  %1154 = vrcp.f32 %v1658_v12 }
  0x5c   :  { %3317 = vst [vmem:[#allocation78_spill] sm:$0xff] %v1609_v56  ;;  %3318 = vst [vmem:[#allocation79_spill] sm:$0xff] %v1613_v32  ;;  %v1631_v56 = vmul.f32 %v1566_v13, %v1421_v11  ;;  %v1633_v32 = vpop.eup %1124  ;;  %v1653_v13 = vld [vmem:[#allocation5 + $0x80] sm:$0xff]  ;;  %1156 = vrcp.f32 %v1676_v21  ;;  %v3406_v2 = vld [vmem:[#allocation64_spill] sm:$0xff] }
  0x5d   :  { %3319 = vst [vmem:[#allocation80_spill] sm:$0xff] %v1615_v42  ;;  %3320 = vst [vmem:[#allocation81_spill] sm:$0xff] %v1617_v45  ;;  %v1709_v45 = vld [vmem:[#allocation5 + $0xb8] sm:$0xff] }
  0x5e   :  { %3321 = vst [vmem:[#allocation82_spill] sm:$0xff] %v1619_v44  ;;  %3322 = vst [vmem:[#allocation83_spill] sm:$0xff] %v1622_v54  ;;  %v1717_v54 = vmul.f32 %v1653_v13, %v1448_v43 }
  0x5f   :  { %3323 = vst [vmem:[#allocation84_spill] sm:$0xff] %v1627_v50  ;;  %3324 = vst [vmem:[#allocation85_spill] sm:$0xff] %v1631_v56  ;;  %v1649_v50 = vmul.f32 %v1583_v22, %v1427_v17  ;;  %v1651_v56 = vpop.eup %1126  ;;  %v1671_v22 = vld [vmem:[#allocation5 + $0x90] sm:$0xff]  ;;  %1158 = vrcp.f32 %v1694_v30 }
  0x60   :  { %3325 = vst [vmem:[#allocation86_spill] sm:$0xff] %v1633_v32  ;;  %3326 = vst [vmem:[#allocation87_spill] sm:$0xff] %v1635_v60  ;;  %v1731_v60 = vmul.f32 %v1671_v22, %v1454_v51 }
  0x61   :  { %3327 = vst [vmem:[#allocation88_spill] sm:$0xff] %v1637_v58  ;;  %3328 = vst [vmem:[#allocation89_spill] sm:$0xff] %v1640_v61  ;;  %v1735_v61 = vmul.f32 %v1673_v29, %v1457_v55 }
  0x62   :  { %3329 = vst [vmem:[#allocation90_spill] sm:$0xff] %v1645_v4  ;;  %3330 = vst [vmem:[#allocation91_spill] sm:$0xff] %v1649_v50  ;;  %v1667_v4 = vmul.f32 %v1601_v37, %v1433_v23  ;;  %v1669_v50 = vpop.eup %1128  ;;  %v1689_v37 = vld [vmem:[#allocation5 + $0xa0] sm:$0xff]  ;;  %1160 = vrcp.f32 %v1712_v38  ;;  %v3417_v35 = vld [vmem:[#allocation76_spill] sm:$0xff] }
  0x63   :  { %3331 = vst [vmem:[#allocation92_spill] sm:$0xff] %v1651_v56  ;;  %3332 = vst [vmem:[#allocation93_spill] sm:$0xff] %v1653_v13  ;;  %v1801_v13 = vadd.f32 1.0, %v1597_v25 }
  0x64   :  { %3333 = vst [vmem:[#allocation94_spill] sm:$0xff] %v1655_v15  ;;  %3334 = vst [vmem:[#allocation95_spill] sm:$0xff] %v1658_v12  ;;  %v1749_v12 = vmul.f32 %v1691_v40, %v1463_v63 }
  0x65   :  { %3335 = vst [vmem:[#allocation96_spill] sm:$0xff] %v1663_v19  ;;  %3336 = vst [vmem:[#allocation97_spill] sm:$0xff] %v1667_v4  ;;  %v1685_v19 = vmul.f32 %v1619_v44, %v1439_v31  ;;  %v1687_v4 = vpop.eup %1130  ;;  %v1707_v44 = vld [vmem:[#allocation5 + $0xb0] sm:$0xff] }
  0x66   :  { %3337 = vst [vmem:[#allocation98_spill] sm:$0xff] %v1669_v50  ;;  %3338 = vst [vmem:[#allocation99_spill] sm:$0xff] %v1671_v22  ;;  %v1798_v22 = vadd.f32 1.0, %v1579_v36  ;;  %v1824_v36 = vadd.f32 1.0, %v1687_v4 }
  0x67   :  { %3339 = vst [vmem:[#allocation100_spill] sm:$0xff] %v1673_v29  ;;  %3340 = vst [vmem:[#allocation101_spill] sm:$0xff] %v1676_v21  ;;  %v1754_v29 = vadd.f32 1.0, %v1527_v8  ;;  %v1763_v21 = vmul.f32 %v1709_v45, %v1469_v16 }
  0x68   :  { %3341 = vst [vmem:[#allocation102_spill] sm:$0xff] %v1681_v41  ;;  %3342 = vst [vmem:[#allocation103_spill] sm:$0xff] %v1685_v19  ;;  %v1703_v41 = vmul.f32 %v1637_v58, %v1445_v39  ;;  %v1705_v19 = vpop.eup %1132  ;;  %v1726_v58 = vadd.f32 1.0, %v1523_v57  ;;  %v3418_v39 = vld [vmem:[#allocation38_spill] sm:$0xff] }
  0x69   :  { %3343 = vst [vmem:[#allocation104_spill] sm:$0xff] %v1687_v4  ;;  %3344 = vst [vmem:[#allocation105_spill] sm:$0xff] %v1689_v37 }
  0x6a   :  { %3345 = vst [vmem:[#allocation106_spill] sm:$0xff] %v1691_v40  ;;  %3346 = vst [vmem:[#allocation107_spill] sm:$0xff] %v1694_v30  ;;  %v1768_v40 = vadd.f32 1.0, %v1529_v18  ;;  %1162 = vrcp.f32 %v1726_v58  ;;  %v3386_v18 = vld [vmem:[#allocation35_spill] sm:$0xff] }
  0x6b   :  { %3347 = vst [vmem:[#allocation108_spill] sm:$0xff] %v1699_v48  ;;  %3348 = vst [vmem:[#allocation109_spill] sm:$0xff] %v1703_v41  ;;  %v1721_v48 = vmul.f32 %v1655_v15, %v1451_v47  ;;  %v1723_v41 = vpop.eup %1134  ;;  %v1740_v15 = vadd.f32 1.0, %v1525_v49 }
  0x6c   :  { %3349 = vst [vmem:[#allocation110_spill] sm:$0xff] %v1705_v19  ;;  %3350 = vst [vmem:[#allocation111_spill] sm:$0xff] %v1707_v44  ;;  %v1840_v4 = vadd.f32 1.0, %v1723_v41 }
  0x6d   :  { %3351 = vst [vmem:[#allocation112_spill] sm:$0xff] %v1709_v45  ;;  %3352 = vst [vmem:[#allocation113_spill] sm:$0xff] %v1712_v38  ;;  %v1787_v45 = vadd.f32 1.0, %v1553_v53  ;;  %1164 = vrcp.f32 %v1740_v15  ;;  %v1808_v53 = vadd.f32 1.0, %v1615_v42 }
  0x6e   :  { %3353 = vst [vmem:[#allocation114_spill] sm:$0xff] %v1717_v54  ;;  %3354 = vst [vmem:[#allocation115_spill] sm:$0xff] %v1721_v48  ;;  %v1737_v54 = vpop.eup %1136  ;;  %v1745_v48 = vmul.f32 %v1689_v37, %v1460_v59  ;;  %v1774_v37 = vadd.f32 1.0, %v1533_v26  ;;  %1166 = vrcp.f32 %v1754_v29 }
  0x6f   :  { %3355 = vst [vmem:[#allocation116_spill] sm:$0xff] %v1723_v41  ;;  %3356 = vst [vmem:[#allocation117_spill] sm:$0xff] %v1726_v58  ;;  %1168 = vrcp.f32 %v1768_v40 }
  0x70   :  { %3357 = vst [vmem:[#allocation118_spill] sm:$0xff] %v1731_v60  ;;  %3358 = vst [vmem:[#allocation119_spill] sm:$0xff] %v1735_v61  ;;  %v1751_v60 = vpop.eup %1138  ;;  %v1759_v61 = vmul.f32 %v1707_v44, %v1466_v10  ;;  %v1795_v44 = vadd.f32 1.0, %v1562_v6  ;;  %v1814_v6 = vadd.f32 1.0, %v1651_v56  ;;  %v1831_v56 = vadd.f32 1.0, %v1705_v19 }
  0x71   :  { %3359 = vst [vmem:[#allocation120_spill] sm:$0xff] %v1737_v54  ;;  %3360 = vst [vmem:[#allocation121_spill] sm:$0xff] %v1740_v15  ;;  %v1821_v15 = vadd.f32 1.0, %v1669_v50  ;;  %v345_v50 = vmul.f32 %v1751_v60, %v1475_v28  ;;  %v3384_v28 = vld [vmem:[#allocation31_spill] sm:$0xff] }
  0x72   :  { %3361 = vst [vmem:[#allocation122_spill] sm:$0xff] %v1745_v48  ;;  %3362 = vst [vmem:[#allocation123_spill] sm:$0xff] %v1749_v12  ;;  %v1765_v48 = vpop.eup %1140  ;;  %v1771_v12 = vadd.f32 1.0, %v1531_v24 }
  0x73   :  { %3363 = vst [vmem:[#allocation124_spill] sm:$0xff] %v1754_v29  ;;  %3364 = vst [vmem:[#allocation125_spill] sm:$0xff] %v1759_v61  ;;  %v1778_v30 = vpop.eup %1142  ;;  %v1781_v61 = vadd.f32 1.0, %v1535_v33  ;;  %v1850_v29 = vadd.f32 1.0, %v1737_v54 }
  0x74   :  { %3365 = vst [vmem:[#allocation126_spill] sm:$0xff] %v1763_v21  ;;  %3366 = vst [vmem:[#allocation127_spill] sm:$0xff] %v1768_v40  ;;  %v1784_v21 = vadd.f32 1.0, %v1544_v62  ;;  %v1792_v38 = vpop.eup %1144  ;;  %v1811_v62 = vadd.f32 1.0, %v1633_v32  ;;  %1170 = vrcp.f32 %v1771_v12  ;;  %v3383_v32 = vld [vmem:[#allocation29_spill] sm:$0xff] }
  0x75   :  { %3367 = vst [vmem:[#allocation128_spill] sm:$0xff] %v1771_v12  ;;  %3368 = vst [vmem:[#allocation129_spill] sm:$0xff] %v1774_v37  ;;  %v1805_v58 = vpop.eup %1146  ;;  %1172 = vrcp.f32 %v1774_v37  ;;  %v346_v12 = vmul.f32 %v1765_v48, %v1480_v34  ;;  %v348_v37 = vmul.f32 %v1792_v38, %v3384_v28  ;;  %v3385_v34 = vld [vmem:[#allocation33_spill] sm:$0xff]  ;;  %v3392_v28 = vld [vmem:[#allocation52_spill] sm:$0xff] }
  0x76   :  { %3369 = vst [vmem:[#allocation130_spill] sm:$0xff] %v1781_v61  ;;  %3370 = vst [vmem:[#allocation131_spill] sm:$0xff] %v1784_v21  ;;  %v1818_v25 = vpop.eup %1148  ;;  %1174 = vrcp.f32 %v1781_v61  ;;  %v347_v61 = vmul.f32 %v1778_v30, %v3383_v32  ;;  %v349_v32 = vmul.f32 %v1805_v58, %v3385_v34 }
  0x77   :  { %3371 = vst [vmem:[#allocation132_spill] sm:$0xff] %v1787_v45  ;;  %3372 = vst [vmem:[#allocation133_spill] sm:$0xff] %v1795_v44  ;;  %v1828_v42 = vpop.eup %1150  ;;  %1176 = vrcp.f32 %v1784_v21  ;;  %v377_v21 = vsel %vm313_vm0, %v1751_v60, %v345_v50  ;;  %v350_v54 = vmul.f32 %v1818_v25, %v3386_v18  ;;  %vm329_vm0 = vcmp.ge.f32.partialorder %v1448_v43, 0.0  ;;  %v3390_v18 = vld [vmem:[#allocation41_spill] sm:$0xff] }
  0x78   :  { %3373 = vst [vmem:[#allocation134_spill] sm:$0xff] %v1798_v22  ;;  %3374 = vst [vmem:[#allocation135_spill] sm:$0xff] %v1801_v13  ;;  %v1837_v33 = vpop.eup %1152  ;;  %1178 = vrcp.f32 %v1787_v45  ;;  %v379_v50 = vsel %vm315_vm2, %v1778_v30, %v347_v61  ;;  %v380_v61 = vsel %vm316_vm3, %v1792_v38, %v348_v37  ;;  %vm331_vm2 = vcmp.ge.f32.partialorder %v1454_v51, 0.0  ;;  %v3389_v30 = vld [vmem:[#allocation40_spill] sm:$0xff]  ;;  %v3391_v37 = vld [vmem:[#allocation51_spill] sm:$0xff] }
  0x79   :  { %3375 = vst [vmem:[#allocation136_spill] sm:$0xff] %v1808_v53  ;;  %3376 = vst [vmem:[#allocation137_spill] sm:$0xff] %v1811_v62  ;;  %v1847_v40 = vpop.eup %1154  ;;  %1180 = vrcp.f32 %v1795_v44  ;;  %v3387_v44 = vld [vmem:[#allocation37_spill] sm:$0xff]  ;;  %vm332_vm3 = vcmp.ge.f32.partialorder %v1457_v55, 0.0 }
  0x7a   :  { %3377 = vst [vmem:[#allocation138_spill] sm:$0xff] %v1814_v6  ;;  %3378 = vst [vmem:[#allocation139_spill] sm:$0xff] %v1821_v15  ;;  %v1858_v41 = vpop.eup %1156  ;;  %1182 = vrcp.f32 %v1798_v22  ;;  %v378_v22 = vsel %vm314_vm1, %v1765_v48, %v346_v12  ;;  %v351_v26 = vmul.f32 %v1828_v42, %v3387_v44  ;;  %vm330_vm1 = vcmp.ge.f32.partialorder %v1451_v47, 0.0 }
  0x7b   :  { %3379 = vst [vmem:[#allocation140_spill] sm:$0xff] %v1824_v36  ;;  %3380 = vst [vmem:[#allocation141_spill] sm:$0xff] %v1831_v56  ;;  %v1867_v19 = vpop.eup %1158  ;;  %1184 = vrcp.f32 %v1801_v13  ;;  %v3388_v13 = vld [vmem:[#allocation39_spill] sm:$0xff]  ;;  %v354_v44 = vmul.f32 %v1858_v41, %v3390_v18  ;;  %v3394_v18 = vld [vmem:[#allocation56_spill] sm:$0xff] }
  0x7c   :  { %3381 = vst [vmem:[#allocation142_spill] sm:$0xff] %v1840_v4  ;;  %3382 = vst [vmem:[#allocation143_spill] sm:$0xff] %v1850_v29  ;;  %v1874_v24 = vpop.eup %1160  ;;  %1186 = vrcp.f32 %v1808_v53  ;;  %v352_v48 = vmul.f32 %v1837_v33, %v3388_v13  ;;  %v353_v53 = vmul.f32 %v1847_v40, %v3389_v30  ;;  %v381_v13 = vsel %vm317_vm4, %v1805_v58, %v349_v32  ;;  %v3393_v32 = vld [vmem:[#allocation55_spill] sm:$0xff] }
  0x7d   :  { %v1881_v8 = vpop.eup %1162  ;;  %1188 = vrcp.f32 %v1811_v62  ;;  %v355_v38 = vmul.f32 %v1867_v19, %v1519_v46  ;;  %v1933_v62 = vsub.f32 %v377_v21, %v3391_v37  ;;  %v1936_v30 = vsub.f32 %v378_v22, %v3392_v28 }
  0x7e   :  { %v1890_v45 = vpop.eup %1164  ;;  %1190 = vrcp.f32 %v1814_v6  ;;  %v382_v58 = vsel %vm318_vm5, %v1818_v25, %v350_v54  ;;  %v1943_v6 = vsub.f32 %v379_v50, %v3393_v32  ;;  %v1946_v5 = vsub.f32 %v380_v61, %v3394_v18  ;;  %v3395_v54 = vld [vmem:[#allocation59_spill] sm:$0xff]  ;;  %v3429_v18 = vld [vmem:[#allocation86_spill] sm:$0xff] }
  0x7f   :  { %v1903_v60 = vpop.eup %1166  ;;  %1192 = vrcp.f32 %v1821_v15  ;;  %vm333_vm4 = vcmp.ge.f32.partialorder %v1460_v59, 0.0  ;;  %v383_v22 = vsel %vm319_vm6, %v1828_v42, %v351_v26  ;;  %v384_v21 = vsel %vm320_vm7, %v1837_v33, %v352_v48 }
  0x80   :  { %v1916_v12 = vpop.eup %1168  ;;  %1194 = vrcp.f32 %v1824_v36  ;;  %v1957_v25 = vsub.f32 %v381_v13, %v3395_v54  ;;  %vm334_vm5 = vcmp.ge.f32.partialorder %v1463_v63, 0.0  ;;  %v356_v61 = vmul.f32 %v1874_v24, %v1521_v52  ;;  %v3399_v52 = vld [vmem:[#allocation24_spill] sm:$0xff] }
  0x81   :  { %v1171_v34 = vpop.eup %1170  ;;  %1196 = vrcp.f32 %v1831_v56  ;;  %v385_v36 = vsel %vm321_vm8, %v1847_v40, %v353_v53  ;;  %v386_v42 = vsel %vm322_vm9, %v1858_v41, %v354_v44  ;;  %vm335_vm6 = vcmp.ge.f32.partialorder %v1466_v10, 0.0  ;;  %v3396_v41 = vld [vmem:[#allocation46_spill] sm:$0xff]  ;;  %v3397_v53 = vld [vmem:[#allocation47_spill] sm:$0xff]  ;;  %v3398_v56 = vld [vmem:[#allocation48_spill] sm:$0xff] }
  0x82   :  { %v1173_v3 = vpop.eup %1172  ;;  %1198 = vrcp.f32 %v1840_v4  ;;  %v357_v13 = vmul.f32 %v1881_v8, %v1523_v57  ;;  %v358_v33 = vmul.f32 %v1890_v45, %v1525_v49  ;;  %v387_v48 = vsel %vm323_vm10, %v1867_v19, %v355_v38  ;;  %v3400_v49 = vld [vmem:[#allocation49_spill] sm:$0xff]  ;;  %v3402_v38 = vld [vmem:[#allocation60_spill] sm:$0xff] }
  0x83   :  { %v1175_v46 = vpop.eup %1174  ;;  %1200 = vrcp.f32 %v1850_v29  ;;  %vm336_vm7 = vcmp.ge.f32.partialorder %v1469_v16, 0.0  ;;  %v359_v44 = vmul.f32 %v1903_v60, %v3396_v41  ;;  %v360_v4 = vmul.f32 %v1916_v12, %v3397_v53  ;;  %v3403_v29 = vld [vmem:[#allocation63_spill] sm:$0xff]  ;;  %v3404_v41 = vld [vmem:[#allocation26_spill] sm:$0xff]  ;;  %v3433_v63 = vld [vmem:[#allocation104_spill] sm:$0xff] }
  0x84   :  { %v1177_v50 = vpop.eup %1176  ;;  %v361_v15 = vmul.f32 %v1171_v34, %v3398_v56  ;;  %v362_v17 = vmul.f32 %v1173_v3, %v3400_v49  ;;  %v363_v19 = vmul.f32 %v1175_v46, %v3401_v20  ;;  %v1989_v14 = vsub.f32 %v382_v58, %v3402_v38  ;;  %v3407_v49 = vld [vmem:[#allocation69_spill] sm:$0xff]  ;;  %v3414_v38 = vld [vmem:[#allocation58_spill] sm:$0xff] }
  0x85   :  { %v1179_v26 = vpop.eup %1178  ;;  %v1992_v11 = vsub.f32 %v383_v22, %v3403_v29  ;;  %vm338_vm9 = vcmp.ge.f32.partialorder %v3404_v41, 0.0  ;;  %v364_v53 = vmul.f32 %v1177_v50, %v3405_v7  ;;  %v388_v56 = vsel %vm324_vm11, %v1874_v24, %v356_v61  ;;  %v3409_v22 = vld [vmem:[#allocation30_spill] sm:$0xff] }
  0x86   :  { %v1181_v40 = vpop.eup %1180  ;;  %v2000_v1 = vsub.f32 %v384_v21, %v3406_v2  ;;  %v2003_v20 = vsub.f32 %v385_v36, %v3407_v49  ;;  %vm340_vm8 = vcmp.ge.f32.partialorder %v3409_v22, 0.0  ;;  %v389_v29 = vsel %vm325_vm12, %v1881_v8, %v357_v13  ;;  %v3410_v24 = vld [vmem:[#allocation70_spill] sm:$0xff]  ;;  %v3411_v21 = vld [vmem:[#allocation75_spill] sm:$0xff]  ;;  %v3412_v49 = vld [vmem:[#allocation32_spill] sm:$0xff] }
  0x87   :  { %v1183_v57 = vpop.eup %1182  ;;  %v390_v7 = vsel %vm326_vm13, %v1890_v45, %v358_v33  ;;  %v2014_v61 = vsub.f32 %v386_v42, %v3410_v24  ;;  %v2017_v23 = vsub.f32 %v387_v48, %v3411_v21  ;;  %vm341_vm11 = vcmp.ge.f32.partialorder %v3412_v49, 0.0  ;;  %v3413_v2 = vld [vmem:[#allocation34_spill] sm:$0xff]  ;;  %v3415_v13 = vld [vmem:[#allocation36_spill] sm:$0xff]  ;;  %v3425_v21 = vld [vmem:[#allocation93_spill] sm:$0xff] }
  0x88   :  { %v1185_v9 = vpop.eup %1184  ;;  %vm342_vm10 = vcmp.ge.f32.partialorder %v3413_v2, 0.0  ;;  %v365_v54 = vmul.f32 %v1179_v26, %v3414_v38  ;;  %v391_v8 = vsel %vm327_vm14, %v1903_v60, %v359_v44  ;;  %v392_v31 = vsel %vm328_vm15, %v1916_v12, %v360_v4  ;;  %v3416_v33 = vld [vmem:[#allocation62_spill] sm:$0xff]  ;;  %v3419_v4 = vld [vmem:[#allocation68_spill] sm:$0xff] }
  0x89   :  { %v1187_v58 = vpop.eup %1186  ;;  %v393_v45 = vsel %vm329_vm0, %v1171_v34, %v361_v15  ;;  %vm343_vm12 = vcmp.ge.f32.partialorder %v3415_v13, 0.0  ;;  %v366_v48 = vmul.f32 %v1181_v40, %v3416_v33  ;;  %v394_v27 = vsel %vm330_vm1, %v1173_v3, %v362_v17  ;;  %v3420_v15 = vld [vmem:[#allocation81_spill] sm:$0xff]  ;;  %v3421_v33 = vld [vmem:[#allocation82_spill] sm:$0xff] }
  0x8a   :  { %v1189_v36 = vpop.eup %1188  ;;  %v395_v38 = vsel %vm331_vm2, %v1175_v46, %v363_v19  ;;  %v2037_v60 = vsub.f32 %v388_v56, %v3417_v35  ;;  %vm344_vm13 = vcmp.ge.f32.partialorder %v3418_v39, 0.0  ;;  %v367_v43 = vmul.f32 %v1183_v57, %v3419_v4  ;;  %v3422_v17 = vld [vmem:[#allocation74_spill] sm:$0xff]  ;;  %v3423_v46 = vld [vmem:[#allocation87_spill] sm:$0xff]  ;;  %v3424_v19 = vld [vmem:[#allocation88_spill] sm:$0xff] }
  0x8b   :  { %v1191_v42 = vpop.eup %1190  ;;  %v396_v34 = vsel %vm332_vm3, %v1177_v50, %v364_v53  ;;  %v2044_v12 = vsub.f32 %v389_v29, %v3420_v15  ;;  %v2047_v47 = vsub.f32 %v390_v7, %v3421_v33  ;;  %v368_v51 = vmul.f32 %v1185_v9, %v3422_v17  ;;  %v3426_v50 = vld [vmem:[#allocation80_spill] sm:$0xff]  ;;  %v3427_v7 = vld [vmem:[#allocation94_spill] sm:$0xff]  ;;  %v3428_v15 = vld [vmem:[#allocation99_spill] sm:$0xff] }
  0x8c   :  { %v1193_v44 = vpop.eup %1192  ;;  %v2051_v56 = vsub.f32 %v391_v8, %v3423_v46  ;;  %v2054_v35 = vsub.f32 %v392_v31, %v3424_v19  ;;  %v2057_v4 = vsub.f32 %v393_v45, %v3425_v21  ;;  %v369_v53 = vmul.f32 %v1187_v58, %v3426_v50  ;;  %v3430_v19 = vld [vmem:[#allocation100_spill] sm:$0xff] }
  0x8d   :  { %v1195_v3 = vpop.eup %1194  ;;  %v397_v29 = vsel %vm333_vm4, %v1179_v26, %v365_v54  ;;  %v426_v33 = vsub.f32 %v394_v27, %v3427_v7  ;;  %v427_v24 = vsub.f32 %v395_v38, %v3428_v15  ;;  %v370_v8 = vmul.f32 %v1189_v36, %v3429_v18  ;;  %v3431_v21 = vld [vmem:[#allocation92_spill] sm:$0xff]  ;;  %v3432_v54 = vld [vmem:[#allocation98_spill] sm:$0xff]  ;;  %v3435_v18 = vld [vmem:[#allocation105_spill] sm:$0xff] }
  0x8e   :  { %v1197_v55 = vpop.eup %1196  ;;  %v398_v31 = vsel %vm334_vm5, %v1181_v40, %v366_v48  ;;  %v428_v46 = vsub.f32 %v396_v34, %v3430_v19  ;;  %v2070_v45 = vmul.f32 %v1933_v62, %v1933_v62  ;;  %v371_v59 = vmul.f32 %v1191_v42, %v3431_v21  ;;  %v3434_v48 = vld [vmem:[#allocation110_spill] sm:$0xff]  ;;  %v3437_v21 = vld [vmem:[#allocation116_spill] sm:$0xff] }
  0x8f   :  { %v1199_v17 = vpop.eup %1198  ;;  %v372_v26 = vmul.f32 %v1193_v44, %v3432_v54  ;;  %v399_v27 = vsel %vm335_vm6, %v1183_v57, %v367_v43  ;;  %v2078_v38 = vmul.f32 %v1936_v30, %v1936_v30  ;;  %v373_v40 = vmul.f32 %v1195_v3, %v3433_v63  ;;  %v2085_v15 = vld [vmem:[#allocation5 + $0xc0] sm:$0xff]  ;;  %v2095_v63 = vld [vmem:[#allocation5 + $0xc8] sm:$0xff]  ;;  %v3460_v39 = vld [vmem:[#allocation76_spill] sm:$0xff] }
  0x90   :  { %v1201_v50 = vpop.eup %1200  ;;  %v374_v34 = vmul.f32 %v1197_v55, %v3434_v48  ;;  %v400_v62 = vsel %vm336_vm7, %v1185_v9, %v368_v51  ;;  %v429_v19 = vsub.f32 %v397_v29, %v3435_v18  ;;  %3436 = vst [vmem:[#allocation51_spill] sm:$0xff] %v2085_v15  ;;  %v375_v54 = vmul.f32 %v1199_v17, %v3437_v21  ;;  %v3439_v57 = vld [vmem:[#allocation106_spill] sm:$0xff]  ;;  %v3441_v48 = vld [vmem:[#allocation120_spill] sm:$0xff]  ;;  %v3442_v51 = vld [vmem:[#allocation111_spill] sm:$0xff] }
  0x91   :  { %vm3438_vm14 = vcmp.ge.f32.partialorder %v3399_v52, 0.0  ;;  %v430_v43 = vsub.f32 %v398_v31, %v3439_v57  ;;  %v2093_v30 = vmul.f32 %v1943_v6, %v1943_v6  ;;  %3440 = vst [vmem:[#allocation52_spill] sm:$0xff] %v2095_v63  ;;  %v376_v16 = vmul.f32 %v1201_v50, %v3441_v48  ;;  %v2105_v52 = vld [vmem:[#allocation5 + $0xd0] sm:$0xff] }
  0x92   :  { %v401_v10 = vsel %vm3438_vm14, %v1187_v58, %v369_v53  ;;  %v402_v9 = vsel %vm338_vm9, %v1189_v36, %v370_v8  ;;  %v431_v29 = vsub.f32 %v399_v27, %v3442_v51  ;;  %v2103_v21 = vmul.f32 %v1946_v5, %v1946_v5  ;;  %3443 = vst [vmem:[#allocation55_spill] sm:$0xff] %v2105_v52  ;;  %v2107_v58 = vld [vmem:[#allocation5 + $0xd8] sm:$0xff]  ;;  %v3445_v31 = vld [vmem:[#allocation112_spill] sm:$0xff]  ;;  %v2116_v36 = vld [vmem:[#allocation5 + $0xe0] sm:$0xff] }
  0x93   :  { %vm3444_vm15 = vcmp.ge.f32.partialorder %v3408_v0, 0.0  ;;  %v404_v53 = vsel %vm340_vm8, %v1193_v44, %v372_v26  ;;  %v432_v48 = vsub.f32 %v400_v62, %v3445_v31  ;;  %v445_v41 = vmul.f32 %v1957_v25, %v1957_v25  ;;  %3446 = vst [vmem:[#allocation24_spill] sm:$0xff] %v2116_v36  ;;  %v2118_v8 = vld [vmem:[#allocation5 + $0xe8] sm:$0xff]  ;;  %v2136_v26 = vld [vmem:[#allocation5 + $0xf8] sm:$0xff] }
  0x94   :  { %v403_v6 = vsel %vm3444_vm15, %v1191_v42, %v371_v59  ;;  %3447 = vst [vmem:[#allocation26_spill] sm:$0xff] %v2118_v8  ;;  %v405_v5 = vsel %vm341_vm11, %v1195_v3, %v373_v40  ;;  %v406_v27 = vsel %vm342_vm10, %v1197_v55, %v374_v34  ;;  %v433_v0 = vsub.f32 %v401_v10, %v2085_v15  ;;  %v2127_v42 = vld [vmem:[#allocation5 + $0xf0] sm:$0xff] }
  0x95   :  { %v446_v22 = vmul.f32 %v1989_v14, %v1989_v14  ;;  %3448 = vst [vmem:[#allocation28_spill] sm:$0xff] %v2127_v42  ;;  %v407_v25 = vsel %vm343_vm12, %v1199_v17, %v375_v54  ;;  %v434_v44 = vsub.f32 %v402_v9, %v2095_v63  ;;  %v447_v59 = vmul.f32 %v1992_v11, %v1992_v11 }
  0x96   :  { %v448_v3 = vmul.f32 %v2000_v1, %v2000_v1  ;;  %3449 = vst [vmem:[#allocation30_spill] sm:$0xff] %v2136_v26  ;;  %v408_v55 = vsel %vm344_vm13, %v1201_v50, %v376_v16  ;;  %v435_v14 = vsub.f32 %v403_v6, %v2105_v52  ;;  %v436_v40 = vsub.f32 %v404_v53, %v2107_v58 }
  0x97   :  { %v449_v17 = vmul.f32 %v2003_v20, %v2003_v20  ;;  %v437_v54 = vsub.f32 %v405_v5, %v2116_v36  ;;  %v438_v34 = vsub.f32 %v406_v27, %v2118_v8  ;;  %v450_v11 = vmul.f32 %v2014_v61, %v2014_v61 }
  0x98   :  { %v451_v1 = vmul.f32 %v2017_v23, %v2017_v23  ;;  %v439_v62 = vsub.f32 %v407_v25, %v2127_v42  ;;  %v452_v50 = vmul.f32 %v2037_v60, %v2037_v60  ;;  %v453_v10 = vmul.f32 %v2044_v12, %v2044_v12  ;;  %v3450_v25 = vld [vmem:[#allocation56_spill] sm:$0xff]  ;;  %v3455_v42 = vld [vmem:[#allocation69_spill] sm:$0xff] }
  0x99   :  { %v454_v20 = vmul.f32 %v2047_v47, %v2047_v47  ;;  %v440_v16 = vsub.f32 %v408_v55, %v2136_v26  ;;  %v455_v9 = vmul.f32 %v2051_v56, %v2051_v56  ;;  %v456_v61 = vmul.f32 %v2054_v35, %v2054_v35  ;;  %v3451_v35 = vld [vmem:[#allocation59_spill] sm:$0xff]  ;;  %v3452_v55 = vld [vmem:[#allocation60_spill] sm:$0xff] }
  0x9a   :  { %v457_v23 = vmul.f32 %v2057_v4, %v2057_v4  ;;  %v458_v6 = vmul.f32 %v426_v33, %v426_v33  ;;  %v459_v53 = vmul.f32 %v427_v24, %v427_v24  ;;  %v460_v60 = vmul.f32 %v428_v46, %v428_v46  ;;  %v3453_v33 = vld [vmem:[#allocation63_spill] sm:$0xff]  ;;  %v3454_v26 = vld [vmem:[#allocation64_spill] sm:$0xff] }
  0x9b   :  { %v461_v5 = vmul.f32 %v429_v19, %v429_v19  ;;  %vm505_vm0 = vcmp.gt.f32.partialorder %v3391_v37, 0.0  ;;  %vm506_vm1 = vcmp.gt.f32.partialorder %v3392_v28, 0.0  ;;  %vm507_vm2 = vcmp.gt.f32.partialorder %v3393_v32, 0.0 }
  0x9c   :  { %v462_v12 = vmul.f32 %v430_v43, %v430_v43  ;;  %v463_v47 = vmul.f32 %v431_v29, %v431_v29  ;;  %v464_v27 = vmul.f32 %v432_v48, %v432_v48  ;;  %v465_v56 = vmul.f32 %v433_v0, %v433_v0  ;;  %v3456_v43 = vld [vmem:[#allocation70_spill] sm:$0xff]  ;;  %v3457_v48 = vld [vmem:[#allocation75_spill] sm:$0xff] }
  0x9d   :  { %vm508_vm3 = vcmp.gt.f32.partialorder %v3450_v25, 0.0  ;;  %vm509_vm4 = vcmp.gt.f32.partialorder %v3451_v35, 0.0  ;;  %vm510_vm5 = vcmp.gt.f32.partialorder %v3452_v55, 0.0  ;;  %vm511_vm6 = vcmp.gt.f32.partialorder %v3453_v33, 0.0 }
  0x9e   :  { %v466_v24 = vmul.f32 %v434_v44, %v434_v44  ;;  %v467_v4 = vmul.f32 %v435_v14, %v435_v14  ;;  %v468_v46 = vmul.f32 %v436_v40, %v436_v40  ;;  %v469_v19 = vmul.f32 %v437_v54, %v437_v54  ;;  %v3461_v44 = vld [vmem:[#allocation81_spill] sm:$0xff]  ;;  %v3467_v40 = vld [vmem:[#allocation100_spill] sm:$0xff] }
  0x9f   :  { %vm512_vm7 = vcmp.gt.f32.partialorder %v3454_v26, 0.0  ;;  %v470_v29 = vmul.f32 %v438_v34, %v438_v34  ;;  %v2175_v0 = vmul.f32 %v439_v62, %v439_v62  ;;  %v2177_v8 = vmul.f32 %v440_v16, %v440_v16  ;;  %v3465_v16 = vld [vmem:[#allocation93_spill] sm:$0xff] }
  0xa0   :  { %v473_v36 = vmul.f32 0.75, %v2070_v45  ;;  %v474_v54 = vmul.f32 0.75, %v2078_v38  ;;  %v475_v13 = vmul.f32 0.75, %v2093_v30  ;;  %v476_v34 = vmul.f32 0.75, %v2103_v21 }
  0xa1   :  { %3458 = vst [vmem:[#allocation94_spill] sm:$0xff] %v2175_v0  ;;  %3459 = vst [vmem:[#allocation56_spill] sm:$0xff] %v2177_v8  ;;  %v477_v62 = vmul.f32 0.75, %v445_v41  ;;  %v3464_v0 = vld [vmem:[#allocation88_spill] sm:$0xff]  ;;  %v478_v8 = vmul.f32 0.75, %v446_v22  ;;  %v479_v2 = vmul.f32 0.75, %v447_v59 }
  0xa2   :  { %v480_v49 = vmul.f32 0.75, %v448_v3  ;;  %v481_v14 = vmul.f32 0.75, %v449_v17  ;;  %vm524_vm14 = vcmp.gt.f32.partialorder %v3467_v40, 0.0  ;;  %vm525_vm13 = vcmp.gt.f32.partialorder %v3435_v18, 0.0 }
  0xa3   :  { %vm527_vm8 = vcmp.gt.f32.partialorder %v3442_v51, 0.0  ;;  %v482_v21 = vmul.f32 0.75, %v450_v11  ;;  %v483_v38 = vmul.f32 0.75, %v451_v1  ;;  %v484_v30 = vmul.f32 0.75, %v452_v50 }
  0xa4   :  { %v485_v41 = vmul.f32 0.75, %v453_v10  ;;  %vm528_vm9 = vcmp.gt.f32.partialorder %v3445_v31, 0.0  ;;  %vm529_vm11 = vcmp.gt.f32.partialorder %v2085_v15, 0.0  ;;  %vm530_vm10 = vcmp.gt.f32.partialorder %v2095_v63, 0.0 }
  0xa5   :  { %vm531_vm15 = vcmp.gt.f32.partialorder %v2105_v52, 0.0  ;;  %v486_v22 = vmul.f32 0.75, %v454_v20  ;;  %v487_v59 = vmul.f32 0.75, %v455_v9  ;;  %v488_v3 = vmul.f32 0.75, %v456_v61 }
  0xa6   :  { %v489_v17 = vmul.f32 0.75, %v457_v23  ;;  %vm532_vm12 = vcmp.gt.f32.partialorder %v2107_v58, 0.0  ;;  %v490_v57 = vmul.f32 0.75, %v458_v6  ;;  %v491_v51 = vmul.f32 0.75, %v459_v53  ;;  %v3484_v53 = vld [vmem:[#allocation87_spill] sm:$0xff] }
  0xa7   :  { %v492_v11 = vmul.f32 0.75, %v460_v60  ;;  %v493_v1 = vmul.f32 0.75, %v461_v5  ;;  %v494_v50 = vmul.f32 0.75, %v462_v12  ;;  %v495_v10 = vmul.f32 0.75, %v463_v47  ;;  %v3493_v47 = vld [vmem:[#allocation99_spill] sm:$0xff] }
  0xa8   :  { %v496_v18 = vmul.f32 0.75, %v464_v27  ;;  %v497_v31 = vmul.f32 0.75, %v465_v56  ;;  %v498_v40 = vmul.f32 0.75, %v466_v24  ;;  %v499_v15 = vmul.f32 0.75, %v467_v4  ;;  %v3496_v56 = vld [vmem:[#allocation100_spill] sm:$0xff] }
  0xa9   :  { %v500_v45 = vmul.f32 0.75, %v468_v46  ;;  %v2200_v63 = vmul.f32 0.75, %v469_v19  ;;  %v2202_v52 = vmul.f32 0.75, %v470_v29  ;;  %v2207_v20 = vsel %vm505_vm0, %v3391_v37, %v473_v36  ;;  %v3505_v24 = vld [vmem:[#allocation112_spill] sm:$0xff]  ;;  %v3507_v46 = vld [vmem:[#allocation51_spill] sm:$0xff] }
  0xaa   :  { %v2212_v9 = vsel %vm506_vm1, %v3392_v28, %v474_v54  ;;  %v2217_v61 = vsel %vm507_vm2, %v3393_v32, %v475_v13  ;;  %v2222_v23 = vsel %vm508_vm3, %v3450_v25, %v476_v34  ;;  %v2227_v37 = vsel %vm509_vm4, %v3451_v35, %v477_v62  ;;  %v3498_v35 = vld [vmem:[#allocation105_spill] sm:$0xff]  ;;  %v3511_v29 = vld [vmem:[#allocation55_spill] sm:$0xff]  ;;  %v1267_v54 = vld [vmem:[#allocation2 + $0x70] sm:$0xff] }
  0xab   :  { %3468 = vst [vmem:[#allocation59_spill] sm:$0xff] %v2200_v63  ;;  %3469 = vst [vmem:[#allocation60_spill] sm:$0xff] %v2202_v52  ;;  %v2232_v28 = vsel %vm510_vm5, %v3452_v55, %v478_v8  ;;  %v2237_v32 = vsel %vm511_vm6, %v3453_v33, %v479_v2  ;;  %v2242_v13 = vsel %vm512_vm7, %v3454_v26, %v480_v49  ;;  %vm3471_vm0 = vcmp.gt.f32.partialorder %v3455_v42, 0.0  ;;  %v3481_v26 = vld [vmem:[#allocation82_spill] sm:$0xff]  ;;  %v1268_v34 = vld [vmem:[#allocation2 + $0x78] sm:$0xff] }
  0xac   :  { %3470 = vst [vmem:[#allocation63_spill] sm:$0xff] %v2242_v13  ;;  %v2247_v36 = vsel %vm3471_vm0, %v3455_v42, %v481_v14  ;;  %vm3473_vm1 = vcmp.gt.f32.partialorder %v3456_v43, 0.0  ;;  %vm3475_vm2 = vcmp.gt.f32.partialorder %v3457_v48, 0.0  ;;  %vm3477_vm3 = vcmp.gt.f32.partialorder %v3460_v39, 0.0  ;;  %v3500_v33 = vld [vmem:[#allocation106_spill] sm:$0xff]  ;;  %v3518_v63 = vld [vmem:[#allocation24_spill] sm:$0xff] }
  0xad   :  { %3472 = vst [vmem:[#allocation64_spill] sm:$0xff] %v2247_v36  ;;  %v2252_v8 = vsel %vm3473_vm1, %v3456_v43, %v482_v21  ;;  %v2257_v2 = vsel %vm3475_vm2, %v3457_v48, %v483_v38  ;;  %v2262_v49 = vsel %vm3477_vm3, %v3460_v39, %v484_v30  ;;  %vm3479_vm4 = vcmp.gt.f32.partialorder %v3461_v44, 0.0  ;;  %v3509_v43 = vld [vmem:[#allocation52_spill] sm:$0xff] }
  0xae   :  { %3474 = vst [vmem:[#allocation69_spill] sm:$0xff] %v2252_v8  ;;  %3476 = vst [vmem:[#allocation70_spill] sm:$0xff] %v2257_v2  ;;  %v2267_v42 = vsel %vm3479_vm4, %v3461_v44, %v485_v41  ;;  %vm3482_vm5 = vcmp.gt.f32.partialorder %v3481_v26, 0.0  ;;  %vm3485_vm6 = vcmp.gt.f32.partialorder %v3484_v53, 0.0  ;;  %vm3487_vm7 = vcmp.gt.f32.partialorder %v3464_v0, 0.0  ;;  %v1266_v44 = vld [vmem:[#allocation2 + $0x68] sm:$0xff] }
  0xaf   :  { %3478 = vst [vmem:[#allocation75_spill] sm:$0xff] %v2262_v49  ;;  %3480 = vst [vmem:[#allocation76_spill] sm:$0xff] %v2267_v42  ;;  %v2272_v6 = vsel %vm3482_vm5, %v3481_v26, %v486_v22  ;;  %v2277_v60 = vsel %vm3485_vm6, %v3484_v53, %v487_v59  ;;  %v2282_v39 = vsel %vm3487_vm7, %v3464_v0, %v488_v3  ;;  %vm3489_vm0 = vcmp.gt.f32.partialorder %v3465_v16, 0.0  ;;  %v1271_v30 = vld [vmem:[#allocation2 + $0x90] sm:$0xff]  ;;  %v1272_v22 = vld [vmem:[#allocation2 + $0x98] sm:$0xff] }
  0xb0   :  { %3483 = vst [vmem:[#allocation81_spill] sm:$0xff] %v2272_v6  ;;  %3486 = vst [vmem:[#allocation88_spill] sm:$0xff] %v2277_v60  ;;  %v2287_v5 = vsel %vm3489_vm0, %v3465_v16, %v489_v17  ;;  %vm3491_vm1 = vcmp.gt.f32.partialorder %v3427_v7, 0.0  ;;  %vm3494_vm2 = vcmp.gt.f32.partialorder %v3493_v47, 0.0  ;;  %v2302_v25 = vsel %vm524_vm14, %v3496_v56, %v492_v11  ;;  %v1269_v16 = vld [vmem:[#allocation2 + $0x80] sm:$0xff]  ;;  %v1274_v17 = vld [vmem:[#allocation2 + $0xa8] sm:$0xff] }
  0xb1   :  { %3488 = vst [vmem:[#allocation93_spill] sm:$0xff] %v2282_v39  ;;  %3490 = vst [vmem:[#allocation82_spill] sm:$0xff] %v2287_v5  ;;  %v2292_v12 = vsel %vm3491_vm1, %v3427_v7, %v490_v57  ;;  %v2297_v27 = vsel %vm3494_vm2, %v3493_v47, %v491_v51  ;;  %v2307_v55 = vsel %vm525_vm13, %v3498_v35, %v493_v1  ;;  %vm3501_vm3 = vcmp.gt.f32.partialorder %v3500_v33, 0.0  ;;  %v3503_v57 = vld [vmem:[#allocation111_spill] sm:$0xff]  ;;  %v1273_v59 = vld [vmem:[#allocation2 + $0xa0] sm:$0xff] }
  0xb2   :  { %3492 = vst [vmem:[#allocation87_spill] sm:$0xff] %v2292_v12  ;;  %3495 = vst [vmem:[#allocation99_spill] sm:$0xff] %v2297_v27  ;;  %v2312_v7 = vsel %vm3501_vm3, %v3500_v33, %v494_v50  ;;  %v2317_v51 = vsel %vm527_vm8, %v3503_v57, %v495_v10  ;;  %v2322_v4 = vsel %vm528_vm9, %v3505_v24, %v496_v18  ;;  %v582_v14 = vmax.f32 %v1266_v44, 0.0  ;;  %v1276_v50 = vld [vmem:[#allocation2 + $0xb8] sm:$0xff]  ;;  %v1277_v26 = vld [vmem:[#allocation2 + $0xc0] sm:$0xff] }
  0xb3   :  { %3497 = vst [vmem:[#allocation100_spill] sm:$0xff] %v2302_v25  ;;  %3499 = vst [vmem:[#allocation105_spill] sm:$0xff] %v2307_v55  ;;  %v2327_v19 = vsel %vm529_vm11, %v3507_v46, %v497_v31  ;;  %v2332_v48 = vsel %vm530_vm10, %v3509_v43, %v498_v40  ;;  %v2337_v0 = vsel %vm531_vm15, %v3511_v29, %v499_v15  ;;  %v583_v31 = vmax.f32 %v1267_v54, 0.0  ;;  %v1270_v40 = vld [vmem:[#allocation2 + $0x88] sm:$0xff]  ;;  %v1279_v35 = vld [vmem:[#allocation2 + $0xd0] sm:$0xff] }
  0xb4   :  { %3502 = vst [vmem:[#allocation106_spill] sm:$0xff] %v2312_v7  ;;  %3504 = vst [vmem:[#allocation111_spill] sm:$0xff] %v2317_v51  ;;  %v2342_v18 = vsel %vm532_vm12, %v2107_v58, %v500_v45  ;;  %v584_v62 = vmax.f32 %v1268_v34, 0.0  ;;  %v585_v21 = vmax.f32 %v1269_v16, 0.0  ;;  %v586_v38 = vmax.f32 %v1270_v40, 0.0  ;;  %v1275_v45 = vld [vmem:[#allocation2 + $0xb0] sm:$0xff] }
  0xb5   :  { %3506 = vst [vmem:[#allocation112_spill] sm:$0xff] %v2322_v4  ;;  %3508 = vst [vmem:[#allocation51_spill] sm:$0xff] %v2327_v19  ;;  %v587_v41 = vmax.f32 %v1271_v30, 0.0  ;;  %v588_v15 = vmax.f32 %v1272_v22, 0.0  ;;  %v589_v3 = vmax.f32 %v1273_v59, 0.0  ;;  %v590_v11 = vmax.f32 %v1274_v17, 0.0 }
  0xb6   :  { %3510 = vst [vmem:[#allocation52_spill] sm:$0xff] %v2332_v48  ;;  %3512 = vst [vmem:[#allocation55_spill] sm:$0xff] %v2337_v0  ;;  %v591_v1 = vmax.f32 %v1275_v45, 0.0  ;;  %v592_v10 = vmax.f32 %v1276_v50, 0.0  ;;  %v593_v53 = vmax.f32 %v1277_v26, 0.0  ;;  %v1278_v47 = vld [vmem:[#allocation2 + $0xc8] sm:$0xff]  ;;  %v625_v17 = vmul.f32 %v1277_v26, %v3507_v46 }
  0xb7   :  { %3513 = vst [vmem:[#allocation144_spill] sm:$0xff] %v2342_v18  ;;  %v594_v56 = vmax.f32 %v1278_v47, 0.0  ;;  %v595_v33 = vmax.f32 %v1279_v35, 0.0  ;;  %v1280_v57 = vld [vmem:[#allocation2 + $0xd8] sm:$0xff]  ;;  %v3514_v44 = vld [vmem:[#allocation32_spill] sm:$0xff]  ;;  %v3517_v22 = vld [vmem:[#allocation38_spill] sm:$0xff]  ;;  %v626_v45 = vmul.f32 %v1278_v47, %v3509_v43  ;;  %v627_v50 = vmul.f32 %v1279_v35, %v3511_v29 }
  0xb8   :  { %v596_v24 = vmax.f32 %v1280_v57, 0.0  ;;  %v597_v54 = vmax.f32 %v3514_v44, 0.0  ;;  %v3516_v40 = vld [vmem:[#allocation36_spill] sm:$0xff]  ;;  %v628_v52 = vmul.f32 %v1280_v57, %v2107_v58  ;;  %v1281_v18 = vld [vmem:[#allocation2 + $0xe0] sm:$0xff]  ;;  %v1282_v48 = vld [vmem:[#allocation2 + $0xe8] sm:$0xff] }
  0xb9   :  { %v629_v0 = vmul.f32 %v1281_v18, %v3518_v63  ;;  %v3519_v19 = vld [vmem:[#allocation26_spill] sm:$0xff]  ;;  %v3521_v16 = vld [vmem:[#allocation28_spill] sm:$0xff]  ;;  %v3526_v26 = vld [vmem:[#allocation11_spill] sm:$0xff] }
  0xba   :  { %v2354_v44 = vmul.f32 %v1282_v48, %v3519_v19  ;;  %v2358_v30 = vmul.f32 %v3521_v16, %v3516_v40  ;;  %v3523_v59 = vld [vmem:[#allocation30_spill] sm:$0xff]  ;;  %v3527_v29 = vmax.f32 %v3526_v26, 0.0  ;;  %v3528_v58 = vld [vmem:[#allocation67_spill] sm:$0xff]  ;;  %v3529_v35 = vld [vmem:[#allocation12_spill] sm:$0xff] }
  0xbb   :  { %v2362_v46 = vmul.f32 %v3523_v59, %v3517_v22  ;;  %v3525_v43 = vld [vmem:[#allocation66_spill] sm:$0xff]  ;;  %v3530_v18 = vmax.f32 %v3529_v35, 0.0  ;;  %v3531_v19 = vld [vmem:[#allocation72_spill] sm:$0xff]  ;;  %v3532_v48 = vld [vmem:[#allocation13_spill] sm:$0xff] }
  0xbc   :  { %3520 = vst [vmem:[#allocation32_spill] sm:$0xff] %v2354_v44  ;;  %3522 = vst [vmem:[#allocation26_spill] sm:$0xff] %v2358_v30  ;;  %v2367_v47 = vsub.f32 %v3527_v29, %v3525_v43  ;;  %v3533_v34 = vmax.f32 %v3532_v48, 0.0  ;;  %v3534_v16 = vld [vmem:[#allocation73_spill] sm:$0xff]  ;;  %v3535_v40 = vld [vmem:[#allocation14_spill] sm:$0xff] }
  0xbd   :  { %3524 = vst [vmem:[#allocation28_spill] sm:$0xff] %v2362_v46  ;;  %v2372_v57 = vsub.f32 %v3530_v18, %v3528_v58  ;;  %v3536_v30 = vmax.f32 %v3535_v40, 0.0  ;;  %v3537_v22 = vld [vmem:[#allocation78_spill] sm:$0xff]  ;;  %v3538_v46 = vld [vmem:[#allocation15_spill] sm:$0xff]  ;;  %v3541_v4 = vld [vmem:[#allocation16_spill] sm:$0xff] }
  0xbe   :  { %v2377_v44 = vsub.f32 %v3533_v34, %v3531_v19  ;;  %v3539_v26 = vmax.f32 %v3538_v46, 0.0  ;;  %v3540_v29 = vld [vmem:[#allocation79_spill] sm:$0xff]  ;;  %v3542_v35 = vmax.f32 %v3541_v4, 0.0  ;;  %v3543_v18 = vld [vmem:[#allocation84_spill] sm:$0xff]  ;;  %v3544_v51 = vld [vmem:[#allocation17_spill] sm:$0xff] }
  0xbf   :  { %v2382_v59 = vsub.f32 %v3536_v30, %v3534_v16  ;;  %v3545_v48 = vmax.f32 %v3544_v51, 0.0  ;;  %v3546_v19 = vld [vmem:[#allocation85_spill] sm:$0xff]  ;;  %v3547_v7 = vld [vmem:[#allocation18_spill] sm:$0xff]  ;;  %v3550_v63 = vld [vmem:[#allocation19_spill] sm:$0xff] }
  0xc0   :  { %v2387_v43 = vsub.f32 %v3539_v26, %v3537_v22  ;;  %v2392_v58 = vsub.f32 %v3542_v35, %v3540_v29  ;;  %v3548_v40 = vmax.f32 %v3547_v7, 0.0  ;;  %v3549_v16 = vld [vmem:[#allocation90_spill] sm:$0xff]  ;;  %v3551_v46 = vmax.f32 %v3550_v63, 0.0  ;;  %v3552_v26 = vld [vmem:[#allocation91_spill] sm:$0xff]  ;;  %v3553_v55 = vld [vmem:[#allocation20_spill] sm:$0xff] }
  0xc1   :  { %v2397_v34 = vsub.f32 %v3545_v48, %v3543_v18  ;;  %v3554_v4 = vmax.f32 %v3553_v55, 0.0  ;;  %v3556_v35 = vld [vmem:[#allocation96_spill] sm:$0xff]  ;;  %v3557_v25 = vld [vmem:[#allocation21_spill] sm:$0xff]  ;;  %v3561_v27 = vld [vmem:[#allocation22_spill] sm:$0xff] }
  0xc2   :  { %v2402_v30 = vsub.f32 %v3548_v40, %v3546_v19  ;;  %v2407_v22 = vsub.f32 %v3551_v46, %v3549_v16  ;;  %v3558_v51 = vmax.f32 %v3557_v25, 0.0  ;;  %v3560_v48 = vld [vmem:[#allocation97_spill] sm:$0xff]  ;;  %v3562_v7 = vmax.f32 %v3561_v27, 0.0  ;;  %v3564_v40 = vld [vmem:[#allocation102_spill] sm:$0xff]  ;;  %v3565_v12 = vld [vmem:[#allocation23_spill] sm:$0xff] }
  0xc3   :  { %v2412_v29 = vsub.f32 %v3554_v4, %v3552_v26  ;;  %v3566_v63 = vmax.f32 %v3565_v12, 0.0  ;;  %v3568_v46 = vld [vmem:[#allocation103_spill] sm:$0xff]  ;;  %v3570_v55 = vld [vmem:[#allocation108_spill] sm:$0xff]  ;;  %v3572_v4 = vld [vmem:[#allocation109_spill] sm:$0xff] }
  0xc4   :  { %v2417_v18 = vsub.f32 %v3558_v51, %v3556_v35  ;;  %v2422_v19 = vsub.f32 %v3562_v7, %v3560_v48  ;;  %v2430_v5 = vsub.f32 %v582_v14, %v3568_v46  ;;  %v2433_v26 = vsub.f32 %v583_v31, %v3570_v55  ;;  %v3574_v35 = vld [vmem:[#allocation114_spill] sm:$0xff]  ;;  %v3576_v27 = vld [vmem:[#allocation115_spill] sm:$0xff]  ;;  %v3580_v12 = vld [vmem:[#allocation53_spill] sm:$0xff] }
  0xc5   :  { %3555 = vst [vmem:[#allocation30_spill] sm:$0xff] %v2412_v29  ;;  %v2427_v16 = vsub.f32 %v3566_v63, %v3564_v40  ;;  %v2436_v25 = vsub.f32 %v584_v62, %v3572_v4  ;;  %v2439_v51 = vsub.f32 %v585_v21, %v3574_v35  ;;  %v2442_v48 = vsub.f32 %v586_v38, %v3576_v27  ;;  %v3578_v7 = vld [vmem:[#allocation118_spill] sm:$0xff]  ;;  %v3581_v40 = vld [vmem:[#allocation119_spill] sm:$0xff]  ;;  %v3587_v55 = vld [vmem:[#allocation57_spill] sm:$0xff] }
  0xc6   :  { %3559 = vst [vmem:[#allocation66_spill] sm:$0xff] %v2417_v18  ;;  %3563 = vst [vmem:[#allocation11_spill] sm:$0xff] %v2422_v19  ;;  %v2445_v39 = vsub.f32 %v587_v41, %v3578_v7  ;;  %1202 = vlog2.f32 %v3580_v12  ;;  %v2449_v14 = vsub.f32 %v588_v15, %v3581_v40  ;;  %v3583_v63 = vld [vmem:[#allocation122_spill] sm:$0xff]  ;;  %v3585_v46 = vld [vmem:[#allocation123_spill] sm:$0xff] }
  0xc7   :  { %3567 = vst [vmem:[#allocation67_spill] sm:$0xff] %v2427_v16  ;;  %3569 = vst [vmem:[#allocation12_spill] sm:$0xff] %v2430_v5  ;;  %v2452_v31 = vsub.f32 %v589_v3, %v3583_v63  ;;  %v2455_v62 = vsub.f32 %v590_v11, %v3585_v46  ;;  %1204 = vlog2.f32 %v3587_v55  ;;  %v3588_v21 = vld [vmem:[#allocation125_spill] sm:$0xff]  ;;  %v3590_v38 = vld [vmem:[#allocation126_spill] sm:$0xff]  ;;  %v2470_v46 = vsub.f32 %v593_v53, %v625_v17 }
  0xc8   :  { %3571 = vst [vmem:[#allocation72_spill] sm:$0xff] %v2433_v26  ;;  %3573 = vst [vmem:[#allocation13_spill] sm:$0xff] %v2436_v25  ;;  %v2459_v4 = vsub.f32 %v591_v1, %v3588_v21  ;;  %v2462_v35 = vsub.f32 %v592_v10, %v3590_v38  ;;  %v3592_v41 = vld [vmem:[#allocation25_spill] sm:$0xff]  ;;  %v3594_v12 = vld [vmem:[#allocation27_spill] sm:$0xff]  ;;  %v2475_v38 = vsub.f32 %v594_v56, %v626_v45 }
  0xc9   :  { %3575 = vst [vmem:[#allocation73_spill] sm:$0xff] %v2439_v51  ;;  %3577 = vst [vmem:[#allocation14_spill] sm:$0xff] %v2442_v48  ;;  %v668_v27 = vmul.f32 -0.5, %v3592_v41  ;;  %v3593_v7 = vld [vmem:[#allocation61_spill] sm:$0xff]  ;;  %v671_v15 = vand.u32 2147483647, %v3592_v41 }
  0xca   :  { %3579 = vst [vmem:[#allocation78_spill] sm:$0xff] %v2445_v39  ;;  %3582 = vst [vmem:[#allocation15_spill] sm:$0xff] %v2449_v14  ;;  %1206 = vlog2.f32 %v3593_v7  ;;  %v677_v3 = vmul.f32 -0.5, %v3594_v12  ;;  %v3595_v40 = vld [vmem:[#allocation29_spill] sm:$0xff]  ;;  %v680_v1 = vand.u32 2147483647, %v3594_v12  ;;  %v2483_v14 = vsub.f32 %v597_v54, %v629_v0 }
  0xcb   :  { %3584 = vst [vmem:[#allocation79_spill] sm:$0xff] %v2452_v31  ;;  %3586 = vst [vmem:[#allocation16_spill] sm:$0xff] %v2455_v62  ;;  %v686_v63 = vmul.f32 -0.5, %v3595_v40  ;;  %v3596_v11 = vld [vmem:[#allocation65_spill] sm:$0xff]  ;;  %v3598_v55 = vld [vmem:[#allocation31_spill] sm:$0xff]  ;;  %v2481_v31 = vsub.f32 %v596_v24, %v628_v52  ;;  %v669_v53 = vadd.f32 1.0, %v668_v27 }
  0xcc   :  { %3589 = vst [vmem:[#allocation84_spill] sm:$0xff] %v2459_v4  ;;  %3591 = vst [vmem:[#allocation17_spill] sm:$0xff] %v2462_v35  ;;  %1208 = vlog2.f32 %v3596_v11  ;;  %v695_v21 = vmul.f32 -0.5, %v3598_v55  ;;  %v3599_v10 = vld [vmem:[#allocation71_spill] sm:$0xff]  ;;  %v2477_v35 = vsub.f32 %v595_v33, %v627_v50  ;;  %v3602_v7 = vld [vmem:[#allocation33_spill] sm:$0xff] }
  0xcd   :  { %3597 = vst [vmem:[#allocation85_spill] sm:$0xff] %v2470_v46  ;;  %1210 = vlog2.f32 %v3599_v10  ;;  %3600 = vst [vmem:[#allocation18_spill] sm:$0xff] %v2475_v38  ;;  %v704_v4 = vmul.f32 -0.5, %v3602_v7  ;;  %v3603_v62 = vld [vmem:[#allocation77_spill] sm:$0xff]  ;;  %v689_v17 = vand.u32 2147483647, %v3595_v40 }
  0xce   :  { %3601 = vst [vmem:[#allocation90_spill] sm:$0xff] %v2477_v35  ;;  %1212 = vlog2.f32 %v3603_v62  ;;  %3604 = vst [vmem:[#allocation19_spill] sm:$0xff] %v2481_v31  ;;  %vm2486_vm8 = vcmp.lt.f32.partialorder %v671_v15, 0.0004427343  ;;  %v678_v10 = vadd.f32 1.0, %v677_v3  ;;  %v687_v56 = vadd.f32 1.0, %v686_v63 }
  0xcf   :  { %3605 = vst [vmem:[#allocation91_spill] sm:$0xff] %v2483_v14  ;;  %v698_v33 = vand.u32 2147483647, %v3598_v55  ;;  %vm2491_vm9 = vcmp.lt.f32.partialorder %v680_v1, 0.0004427343  ;;  %v696_v50 = vadd.f32 1.0, %v695_v21  ;;  %v2502_v1 = vmul.f32 %v3592_v41, %v669_v53 }
  0xd0   :  { %v707_v52 = vand.u32 2147483647, %v3602_v7  ;;  %v3610_v0 = vld [vmem:[#allocation35_spill] sm:$0xff]  ;;  %v705_v62 = vadd.f32 1.0, %v704_v4  ;;  %v3612_v15 = vld [vmem:[#allocation37_spill] sm:$0xff]  ;;  %v1203_v63 = vpop.eup %1202  ;;  %v2511_v4 = vmul.f32 %v3594_v12, %v678_v10  ;;  %v2514_v38 = vmul.f32 %v3595_v40, %v687_v56  ;;  %v3620_v48 = vld [vmem:[#allocation40_spill] sm:$0xff] }
  0xd1   :  { %v713_v24 = vmul.f32 -0.5, %v3610_v0  ;;  %v3611_v54 = vld [vmem:[#allocation83_spill] sm:$0xff]  ;;  %v716_v27 = vand.u32 2147483647, %v3610_v0  ;;  %v722_v14 = vmul.f32 -0.5, %v3612_v15  ;;  %v3613_v3 = vld [vmem:[#allocation89_spill] sm:$0xff]  ;;  %v2522_v46 = vmul.f32 %v3598_v55, %v696_v50 }
  0xd2   :  { %1214 = vlog2.f32 %v3611_v54  ;;  %vm2504_vm10 = vcmp.lt.f32.partialorder %v689_v17, 0.0004427343  ;;  %v725_v21 = vand.u32 2147483647, %v3612_v15  ;;  %v3616_v35 = vld [vmem:[#allocation95_spill] sm:$0xff]  ;;  %v1205_v54 = vpop.eup %1204  ;;  %v740_v60 = vmul.f32 -0.5, %v3620_v48 }
  0xd3   :  { %1216 = vlog2.f32 %v3613_v3  ;;  %vm2516_vm11 = vcmp.lt.f32.partialorder %v698_v33, 0.0004427343  ;;  %v3619_v41 = vld [vmem:[#allocation39_spill] sm:$0xff]  ;;  %v714_v39 = vadd.f32 1.0, %v713_v24  ;;  %v2527_v10 = vmul.f32 %v3602_v7, %v705_v62  ;;  %v3627_v7 = vld [vmem:[#allocation101_spill] sm:$0xff]  ;;  %v3650_v19 = vld [vmem:[#allocation124_spill] sm:$0xff] }
  0xd4   :  { %1218 = vlog2.f32 %v3616_v35  ;;  %v731_v53 = vmul.f32 -0.5, %v3619_v41  ;;  %v1207_v17 = vpop.eup %1206  ;;  %v734_v35 = vand.u32 2147483647, %v3619_v41  ;;  %vm2529_vm12 = vcmp.lt.f32.partialorder %v707_v52, 0.0004427343  ;;  %v3629_v42 = vld [vmem:[#allocation107_spill] sm:$0xff] }
  0xd5   :  { %vm2533_vm13 = vcmp.lt.f32.partialorder %v716_v27, 0.0004427343  ;;  %v723_v33 = vadd.f32 1.0, %v722_v14  ;;  %v2537_v50 = vmul.f32 0.6931472, %v1203_v63  ;;  %1220 = vlog2.f32 %v3627_v7  ;;  %v3628_v27 = vld [vmem:[#allocation41_spill] sm:$0xff] }
  0xd6   :  { %v1209_v12 = vpop.eup %1208  ;;  %v2539_v24 = vmul.f32 0.6931472, %v1205_v54  ;;  %vm2541_vm14 = vcmp.lt.f32.partialorder %v725_v21, 0.0004427343  ;;  %v2546_v62 = vmul.f32 0.6931472, %v1207_v17  ;;  %1222 = vlog2.f32 %v3629_v42 }
  0xd7   :  { %v1211_v55 = vpop.eup %1210  ;;  %v732_v6 = vadd.f32 1.0, %v731_v53  ;;  %v749_v25 = vmul.f32 -0.5, %v3628_v27  ;;  %v2551_v14 = vmul.f32 %v3610_v0, %v714_v39  ;;  %vm2553_vm15 = vcmp.lt.f32.partialorder %v734_v35, 0.0004427343  ;;  %v3632_v17 = vld [vmem:[#allocation42_spill] sm:$0xff]  ;;  %v3633_v35 = vld [vmem:[#allocation113_spill] sm:$0xff] }
  0xd8   :  { %v1213_v52 = vpop.eup %1212  ;;  %v741_v21 = vadd.f32 1.0, %v740_v60  ;;  %v743_v54 = vand.u32 2147483647, %v3620_v48  ;;  %v2558_v26 = vmul.f32 0.6931472, %v1209_v12  ;;  %v2563_v53 = vmul.f32 %v3612_v15, %v723_v33  ;;  %v3647_v16 = vld [vmem:[#allocation47_spill] sm:$0xff] }
  0xd9   :  { %v2560_v7 = vmul.f32 0.6931472, %v1211_v55  ;;  %v758_v49 = vmul.f32 -0.5, %v3632_v17  ;;  %v673_v39 = vsel %vm2486_vm8, %v2502_v1, %v2537_v50  ;;  %v2570_v0 = vmul.f32 0.6931472, %v1213_v52 }
  0xda   :  { %v752_v60 = vand.u32 2147483647, %v3628_v27  ;;  %1224 = vlog2.f32 %v3633_v35  ;;  %v682_v15 = vsel %vm2491_vm9, %v2511_v4, %v2539_v24  ;;  %v691_v33 = vsel %vm2504_vm10, %v2514_v38, %v2546_v62  ;;  %v3636_v4 = vld [vmem:[#allocation43_spill] sm:$0xff]  ;;  %v3644_v38 = vld [vmem:[#allocation45_spill] sm:$0xff] }
  0xdb   :  { %v2583_v11 = vmul.f32 %v3619_v41, %v732_v6  ;;  %v750_v1 = vadd.f32 1.0, %v749_v25  ;;  %v2586_v50 = vmul.f32 %v3620_v48, %v741_v21  ;;  %vm2588_vm4 = vcmp.lt.f32.partialorder %v743_v54, 0.0004427343  ;;  %v3640_v54 = vld [vmem:[#allocation117_spill] sm:$0xff] }
  0xdc   :  { %v1215_v42 = vpop.eup %1214  ;;  %v761_v45 = vand.u32 2147483647, %v3632_v17  ;;  %v767_v24 = vmul.f32 -0.5, %v3636_v4  ;;  %v700_v31 = vsel %vm2516_vm11, %v2522_v46, %v2558_v26  ;;  %v759_v48 = vadd.f32 1.0, %v758_v49  ;;  %v3639_v26 = vld [vmem:[#allocation44_spill] sm:$0xff] }
  0xdd   :  { %v1217_v12 = vpop.eup %1216  ;;  %v2602_v25 = vmul.f32 0.6931472, %v1215_v42  ;;  %vm2610_vm5 = vcmp.lt.f32.partialorder %v752_v60, 0.0004427343  ;;  %v776_v46 = vmul.f32 -0.5, %v3639_v26  ;;  %v2618_v21 = vmul.f32 %v3628_v27, %v750_v1 }
  0xde   :  { %v1219_v55 = vpop.eup %1218  ;;  %v2608_v41 = vmul.f32 0.6931472, %v1217_v12  ;;  %v770_v49 = vand.u32 2147483647, %v3636_v4  ;;  %1226 = vlog2.f32 %v3640_v54  ;;  %vm2622_vm6 = vcmp.lt.f32.partialorder %v761_v45, 0.0004427343 }
  0xdf   :  { %v2615_v3 = vmul.f32 0.6931472, %v1219_v55  ;;  %v1221_v42 = vpop.eup %1220  ;;  %v768_v60 = vadd.f32 1.0, %v767_v24  ;;  %v3643_v12 = vld [vmem:[#allocation121_spill] sm:$0xff]  ;;  %v785_v6 = vmul.f32 -0.5, %v3644_v38  ;;  %v2633_v1 = vmul.f32 %v3632_v17, %v759_v48  ;;  %v3646_v45 = vld [vmem:[#allocation46_spill] sm:$0xff] }
  0xe0   :  { %1228 = vlog2.f32 %v3643_v12  ;;  %v1223_v5 = vpop.eup %1222  ;;  %v779_v55 = vand.u32 2147483647, %v3639_v26  ;;  %v794_v54 = vmul.f32 -0.5, %v3646_v45  ;;  %v777_v12 = vadd.f32 1.0, %v776_v46 }
  0xe1   :  { %3645 = vst [vmem:[#allocation20_spill] sm:$0xff] %v2633_v1  ;;  %v788_v2 = vand.u32 2147483647, %v3644_v38  ;;  %v803_v8 = vmul.f32 -0.5, %v3647_v16  ;;  %v2647_v48 = vmul.f32 0.6931472, %v1221_v42  ;;  %1230 = vlog2.f32 %v3650_v19 }
  0xe2   :  { %vm2649_vm7 = vcmp.lt.f32.partialorder %v770_v49, 0.0004427343  ;;  %v2654_v24 = vmul.f32 0.6931472, %v1223_v5  ;;  %v2657_v46 = vmul.f32 %v3636_v4, %v768_v60  ;;  %v786_v18 = vadd.f32 1.0, %v785_v6  ;;  %v3654_v49 = vld [vmem:[#allocation127_spill] sm:$0xff] }
  0xe3   :  { %v797_v13 = vand.u32 2147483647, %v3646_v45  ;;  %vm2660_vm0 = vcmp.lt.f32.partialorder %v779_v55, 0.0004427343  ;;  %v795_v42 = vadd.f32 1.0, %v794_v54  ;;  %1232 = vlog2.f32 %v3654_v49  ;;  %v3657_v60 = vld [vmem:[#allocation48_spill] sm:$0xff] }
  0xe4   :  { %v1225_v36 = vpop.eup %1224  ;;  %3651 = vst [vmem:[#allocation96_spill] sm:$0xff] %v2654_v24  ;;  %v953_v17 = vadd.f32 %v673_v39, %v2367_v47  ;;  %v954_v19 = vadd.f32 %v682_v15, %v2372_v57  ;;  %v2668_v5 = vmul.f32 %v3639_v26, %v777_v12  ;;  %vm2670_vm1 = vcmp.lt.f32.partialorder %v788_v2, 0.0004427343  ;;  %v3658_v39 = vld [vmem:[#allocation128_spill] sm:$0xff]  ;;  %v3659_v15 = vld [vmem:[#allocation49_spill] sm:$0xff] }
  0xe5   :  { %v804_v6 = vadd.f32 1.0, %v803_v8  ;;  %v812_v55 = vmul.f32 -0.5, %v3657_v60  ;;  %v2679_v49 = vmul.f32 0.6931472, %v1225_v36  ;;  %v806_v47 = vand.u32 2147483647, %v3647_v16 }
  0xe6   :  { %v955_v57 = vadd.f32 %v691_v33, %v2377_v44  ;;  %v2688_v8 = vmul.f32 %v3644_v38, %v786_v18  ;;  %1234 = vlog2.f32 %v3658_v39  ;;  %v821_v26 = vmul.f32 -0.5, %v3659_v15  ;;  %v3662_v1 = vld [vmem:[#allocation129_spill] sm:$0xff] }
  0xe7   :  { %v2693_v36 = vmul.f32 %v3646_v45, %v795_v42  ;;  %vm2695_vm2 = vcmp.lt.f32.partialorder %v797_v13, 0.0004427343  ;;  %v956_v44 = vadd.f32 %v700_v31, %v2382_v59  ;;  %v985_v33 = vmul.f32 %v953_v17, %v2207_v20  ;;  %v3665_v20 = vld [vmem:[#allocation50_spill] sm:$0xff] }
  0xe8   :  { %v1227_v12 = vpop.eup %1226  ;;  %v986_v2 = vmul.f32 %v954_v19, %v2212_v9  ;;  %v2703_v38 = vmul.f32 %v3647_v16, %v804_v6  ;;  %v813_v39 = vadd.f32 1.0, %v812_v55  ;;  %v815_v24 = vand.u32 2147483647, %v3657_v60  ;;  %v3667_v19 = vld [vmem:[#allocation130_spill] sm:$0xff] }
  0xe9   :  { %1236 = vlog2.f32 %v3662_v1  ;;  %v772_v13 = vsel %vm2649_vm7, %v2657_v46, %v2679_v49  ;;  %vm2711_vm3 = vcmp.lt.f32.partialorder %v806_v47, 0.0004427343  ;;  %v830_v9 = vmul.f32 -0.5, %v3665_v20  ;;  %v3698_v47 = vld [vmem:[#allocation74_spill] sm:$0xff]  ;;  %v3701_v46 = vld [vmem:[#allocation67_spill] sm:$0xff] }
  0xea   :  { %v1229_v18 = vpop.eup %1228  ;;  %v3666_v16 = vsel %vm2529_vm12, %v2527_v10, %v2560_v7  ;;  %v987_v1 = vmul.f32 %v955_v57, %v2217_v61  ;;  %v2723_v45 = vmul.f32 0.6931472, %v1227_v12  ;;  %v822_v17 = vadd.f32 1.0, %v821_v26  ;;  %v3671_v26 = vld [vmem:[#allocation54_spill] sm:$0xff] }
  0xeb   :  { %v957_v31 = vadd.f32 %v3666_v16, %v2387_v43  ;;  %v824_v42 = vand.u32 2147483647, %v3659_v15  ;;  %1238 = vlog2.f32 %v3667_v19  ;;  %v1231_v6 = vpop.eup %1230  ;;  %v2727_v55 = vmul.f32 0.6931472, %v1229_v18 }
  0xec   :  { %v3668_v40 = vsel %vm2533_vm13, %v2551_v14, %v2570_v0  ;;  %v988_v43 = vmul.f32 %v956_v44, %v2222_v23  ;;  %v1017_v61 = vadd.f32 %v986_v2, %v985_v33  ;;  %v2737_v7 = vmul.f32 %v3657_v60, %v813_v39  ;;  %v3673_v44 = vld [vmem:[#allocation131_spill] sm:$0xff] }
  0xed   :  { %v958_v10 = vadd.f32 %v3668_v40, %v2392_v58  ;;  %vm2739_vm8 = vcmp.lt.f32.partialorder %v815_v24, 0.0004427343  ;;  %v833_v57 = vand.u32 2147483647, %v3665_v20  ;;  %v839_v12 = vmul.f32 -0.5, %v3671_v26  ;;  %v1233_v18 = vpop.eup %1232  ;;  %v3688_v40 = vld [vmem:[#allocation133_spill] sm:$0xff] }
  0xee   :  { %v831_v56 = vadd.f32 1.0, %v830_v9  ;;  %v3672_v23 = vsel %vm2541_vm14, %v2563_v53, %v2602_v25  ;;  %v989_v14 = vmul.f32 %v957_v31, %v2227_v37  ;;  %v1018_v0 = vadd.f32 %v1017_v61, %v987_v1  ;;  %v3681_v31 = vld [vmem:[#allocation132_spill] sm:$0xff] }
  0xef   :  { %v959_v58 = vadd.f32 %v3672_v23, %v2397_v34  ;;  %v781_v24 = vsel %vm2660_vm0, %v2668_v5, %v2723_v45  ;;  %v2756_v60 = vmul.f32 0.6931472, %v1231_v6  ;;  %v2759_v2 = vmul.f32 %v3659_v15, %v822_v17  ;;  %v3682_v45 = vld [vmem:[#allocation62_spill] sm:$0xff]  ;;  %v3692_v61 = vld [vmem:[#allocation96_spill] sm:$0xff] }
  0xf0   :  { %1240 = vlog2.f32 %v3673_v44  ;;  %v790_v34 = vsel %vm2670_vm1, %v2688_v8, %v2727_v55  ;;  %vm2766_vm9 = vcmp.lt.f32.partialorder %v824_v42, 0.0004427343  ;;  %v3676_v29 = vsel %vm2553_vm15, %v2583_v11, %v2608_v41  ;;  %v1235_v5 = vpop.eup %1234  ;;  %v3677_v8 = vld [vmem:[#allocation58_spill] sm:$0xff] }
  0xf1   :  { %v960_v51 = vadd.f32 %v3676_v29, %v2402_v30  ;;  %v990_v53 = vmul.f32 %v958_v10, %v2232_v28  ;;  %v1019_v25 = vadd.f32 %v1018_v0, %v988_v43  ;;  %v2777_v15 = vmul.f32 0.6931472, %v1233_v18  ;;  %v3683_v42 = vld [vmem:[#allocation30_spill] sm:$0xff]  ;;  %v3691_v43 = vld [vmem:[#allocation20_spill] sm:$0xff]  ;;  %v3696_v0 = vld [vmem:[#allocation11_spill] sm:$0xff] }
  0xf2   :  { %v840_v33 = vadd.f32 1.0, %v839_v12  ;;  %v842_v4 = vand.u32 2147483647, %v3671_v26  ;;  %v848_v39 = vmul.f32 -0.5, %v3677_v8  ;;  %v2782_v9 = vmul.f32 %v3665_v20, %v831_v56  ;;  %v3690_v10 = vld [vmem:[#allocation66_spill] sm:$0xff] }
  0xf3   :  { %vm2784_vm10 = vcmp.lt.f32.partialorder %v833_v57, 0.0004427343  ;;  %v3680_v28 = vsel %vm2588_vm4, %v2586_v50, %v2615_v3  ;;  %v991_v11 = vmul.f32 %v959_v58, %v2237_v32  ;;  %v1020_v41 = vadd.f32 %v1019_v25, %v989_v14  ;;  %v1237_v16 = vpop.eup %1236  ;;  %v3685_v50 = vld [vmem:[#allocation63_spill] sm:$0xff]  ;;  %v3695_v58 = vld [vmem:[#allocation134_spill] sm:$0xff] }
  0xf4   :  { %v961_v30 = vadd.f32 %v3680_v28, %v2407_v22  ;;  %v799_v20 = vsel %vm2695_vm2, %v2693_v36, %v2756_v60  ;;  %1242 = vlog2.f32 %v3681_v31  ;;  %v851_v1 = vand.u32 2147483647, %v3677_v8  ;;  %v3697_v60 = vld [vmem:[#allocation69_spill] sm:$0xff]  ;;  %v3703_v28 = vld [vmem:[#allocation135_spill] sm:$0xff] }
  0xf5   :  { %v857_v17 = vmul.f32 -0.5, %v3682_v45  ;;  %v2802_v52 = vmul.f32 0.6931472, %v1235_v5  ;;  %v3684_v32 = vsel %vm2610_vm5, %v2618_v21, %v2647_v48  ;;  %v992_v3 = vmul.f32 %v960_v51, %v3685_v50  ;;  %v1239_v54 = vpop.eup %1238  ;;  %v3689_v21 = vld [vmem:[#allocation68_spill] sm:$0xff]  ;;  %v3744_v50 = vld [vmem:[#allocation143_spill] sm:$0xff] }
  0xf6   :  { %v962_v22 = vadd.f32 %v3684_v32, %v3683_v42  ;;  %v1021_v19 = vadd.f32 %v1020_v41, %v990_v53  ;;  %v808_v36 = vsel %vm2711_vm3, %v2703_v38, %v2777_v15  ;;  %v2816_v6 = vmul.f32 %v3671_v26, %v840_v33  ;;  %v3694_v38 = vld [vmem:[#allocation64_spill] sm:$0xff] }
  0xf7   :  { %vm2818_vm11 = vcmp.lt.f32.partialorder %v842_v4, 0.0004427343  ;;  %v849_v62 = vadd.f32 1.0, %v848_v39  ;;  %1244 = vlog2.f32 %v3688_v40  ;;  %v866_v48 = vmul.f32 -0.5, %v3689_v21  ;;  %v3709_v32 = vld [vmem:[#allocation136_spill] sm:$0xff] }
  0xf8   :  { %v3693_v57 = vsel %vm2622_vm6, %v3691_v43, %v3692_v61  ;;  %v993_v12 = vmul.f32 %v961_v30, %v3694_v38  ;;  %v1022_v26 = vadd.f32 %v1021_v19, %v991_v11  ;;  %v820_v18 = vmul.f32 0.6931472, %v1237_v16  ;;  %v3704_v30 = vld [vmem:[#allocation80_spill] sm:$0xff]  ;;  %v3716_v61 = vld [vmem:[#allocation13_spill] sm:$0xff] }
  0xf9   :  { %v963_v59 = vadd.f32 %v3693_v57, %v3690_v10  ;;  %v858_v56 = vadd.f32 1.0, %v857_v17  ;;  %v860_v23 = vand.u32 2147483647, %v3682_v45  ;;  %1246 = vlog2.f32 %v3695_v58  ;;  %v3713_v19 = vld [vmem:[#allocation76_spill] sm:$0xff]  ;;  %v3715_v10 = vld [vmem:[#allocation86_spill] sm:$0xff] }
  0xfa   :  { %v817_v14 = vsel %vm2739_vm8, %v2737_v7, %v2802_v52  ;;  %v964_v35 = vadd.f32 %v772_v13, %v3696_v0  ;;  %v994_v44 = vmul.f32 %v962_v22, %v3697_v60  ;;  %v1023_v29 = vadd.f32 %v1022_v26, %v992_v3  ;;  %v1241_v51 = vpop.eup %1240  ;;  %v3702_v13 = vld [vmem:[#allocation70_spill] sm:$0xff] }
  0xfb   :  { %v2844_v53 = vmul.f32 0.6931472, %v1239_v54  ;;  %v2847_v25 = vmul.f32 %v3677_v8, %v849_v62  ;;  %v869_v5 = vand.u32 2147483647, %v3689_v21  ;;  %v875_v7 = vmul.f32 -0.5, %v3698_v47 }
  0xfc   :  { %vm2851_vm12 = vcmp.lt.f32.partialorder %v851_v1, 0.0004427343  ;;  %v867_v27 = vadd.f32 1.0, %v866_v48  ;;  %v965_v49 = vadd.f32 %v781_v24, %v3701_v46  ;;  %v995_v33 = vmul.f32 %v963_v59, %v3702_v13  ;;  %v3707_v24 = vld [vmem:[#allocation12_spill] sm:$0xff]  ;;  %v3708_v1 = vld [vmem:[#allocation75_spill] sm:$0xff]  ;;  %v3714_v48 = vld [vmem:[#allocation137_spill] sm:$0xff] }
  0xfd   :  { %v1024_v4 = vadd.f32 %v1023_v29, %v993_v12  ;;  %v826_v39 = vsel %vm2766_vm9, %v2759_v2, %v820_v18  ;;  %v2861_v8 = vmul.f32 %v3682_v45, %v858_v56  ;;  %1248 = vlog2.f32 %v3703_v28  ;;  %v3717_v59 = vld [vmem:[#allocation81_spill] sm:$0xff]  ;;  %v3723_v29 = vld [vmem:[#allocation92_spill] sm:$0xff] }
  0xfe   :  { %v884_v11 = vmul.f32 -0.5, %v3704_v30  ;;  %v838_v41 = vmul.f32 0.6931472, %v1241_v51  ;;  %vm2865_vm13 = vcmp.lt.f32.partialorder %v860_v23, 0.0004427343  ;;  %v966_v31 = vadd.f32 %v790_v34, %v3707_v24  ;;  %v1243_v42 = vpop.eup %1242  ;;  %v3712_v34 = vld [vmem:[#allocation72_spill] sm:$0xff] }
  0xff   :  { %v996_v17 = vmul.f32 %v964_v35, %v3708_v1  ;;  %v1025_v52 = vadd.f32 %v1024_v4, %v994_v44  ;;  %v835_v2 = vsel %vm2784_vm10, %v2782_v9, %v2844_v53  ;;  %v876_v37 = vadd.f32 1.0, %v875_v7  ;;  %v3718_v23 = vld [vmem:[#allocation138_spill] sm:$0xff]  ;;  %v3725_v7 = vld [vmem:[#allocation139_spill] sm:$0xff] }
 0x100   :  { %v878_v45 = vand.u32 2147483647, %v3698_v47  ;;  %1250 = vlog2.f32 %v3709_v32  ;;  %v2878_v22 = vmul.f32 %v3689_v21, %v867_v27  ;;  %vm2880_vm14 = vcmp.lt.f32.partialorder %v869_v5, 0.0004427343  ;;  %v3724_v5 = vld [vmem:[#allocation98_spill] sm:$0xff] }
 0x101   :  { %v967_v3 = vadd.f32 %v799_v20, %v3712_v34  ;;  %v997_v54 = vmul.f32 %v965_v49, %v3713_v19  ;;  %v1026_v62 = vadd.f32 %v1025_v52, %v995_v33  ;;  %v1245_v40 = vpop.eup %1244  ;;  %v885_v63 = vadd.f32 1.0, %v884_v11  ;;  %v3726_v27 = vld [vmem:[#allocation14_spill] sm:$0xff]  ;;  %v3727_v49 = vld [vmem:[#allocation93_spill] sm:$0xff]  ;;  %v3739_v19 = vld [vmem:[#allocation87_spill] sm:$0xff] }
 0x102   :  { %v887_v9 = vand.u32 2147483647, %v3704_v30  ;;  %1252 = vlog2.f32 %v3714_v48  ;;  %v893_v43 = vmul.f32 -0.5, %v3715_v10  ;;  %v844_v21 = vsel %vm2818_vm11, %v2816_v6, %v838_v41  ;;  %v3721_v6 = vld [vmem:[#allocation73_spill] sm:$0xff] }
 0x103   :  { %v968_v57 = vadd.f32 %v808_v36, %v3716_v61  ;;  %v998_v38 = vmul.f32 %v966_v31, %v3717_v59  ;;  %v1027_v20 = vadd.f32 %v1026_v62, %v996_v17  ;;  %v1247_v12 = vpop.eup %1246  ;;  %v847_v26 = vmul.f32 0.6931472, %v1243_v42  ;;  %v3722_v36 = vld [vmem:[#allocation88_spill] sm:$0xff]  ;;  %v3733_v31 = vld [vmem:[#allocation78_spill] sm:$0xff]  ;;  %v3737_v34 = vld [vmem:[#allocation141_spill] sm:$0xff] }
 0x104   :  { %v2895_v18 = vmul.f32 %v3698_v47, %v876_v37  ;;  %v896_v56 = vand.u32 2147483647, %v3715_v10  ;;  %1254 = vlog2.f32 %v3718_v23  ;;  %v856_v58 = vmul.f32 0.6931472, %v1245_v40  ;;  %v3734_v17 = vld [vmem:[#allocation82_spill] sm:$0xff] }
 0x105   :  { %vm2899_vm15 = vcmp.lt.f32.partialorder %v878_v45, 0.0004427343  ;;  %v969_v55 = vadd.f32 %v817_v14, %v3721_v6  ;;  %v999_v35 = vmul.f32 %v967_v3, %v3722_v36  ;;  %v1028_v60 = vadd.f32 %v1027_v20, %v997_v54 }
 0x106   :  { %v894_v44 = vadd.f32 1.0, %v893_v43  ;;  %v902_v51 = vmul.f32 -0.5, %v3723_v29  ;;  %v905_v53 = vand.u32 2147483647, %v3723_v29  ;;  %v911_v47 = vmul.f32 -0.5, %v3724_v5  ;;  %v3742_v43 = vld [vmem:[#allocation79_spill] sm:$0xff] }
 0x107   :  { %1256 = vlog2.f32 %v3725_v7  ;;  %v970_v46 = vadd.f32 %v826_v39, %v3726_v27  ;;  %v1000_v13 = vmul.f32 %v968_v57, %v3727_v49  ;;  %v1029_v33 = vadd.f32 %v1028_v60, %v998_v38  ;;  %v1249_v4 = vpop.eup %1248  ;;  %v3732_v39 = vld [vmem:[#allocation140_spill] sm:$0xff]  ;;  %v3743_v57 = vld [vmem:[#allocation99_spill] sm:$0xff]  ;;  %v3751_v7 = vld [vmem:[#allocation105_spill] sm:$0xff] }
 0x108   :  { %v853_v14 = vsel %vm2851_vm12, %v2847_v25, %v847_v26  ;;  %v865_v28 = vmul.f32 0.6931472, %v1247_v12  ;;  %v2915_v11 = vmul.f32 %v3704_v30, %v885_v63  ;;  %vm2917_vm4 = vcmp.lt.f32.partialorder %v887_v9, 0.0004427343  ;;  %v3740_v9 = vld [vmem:[#allocation104_spill] sm:$0xff] }
 0x109   :  { %vm2921_vm5 = vcmp.lt.f32.partialorder %v896_v56, 0.0004427343  ;;  %1258 = vlog2.f32 %v3732_v39  ;;  %v971_v1 = vadd.f32 %v835_v2, %v3733_v31  ;;  %v1001_v52 = vmul.f32 %v969_v55, %v3734_v17  ;;  %v3738_v2 = vld [vmem:[#allocation15_spill] sm:$0xff]  ;;  %v3745_v56 = vld [vmem:[#allocation16_spill] sm:$0xff]  ;;  %v3756_v39 = vld [vmem:[#allocation17_spill] sm:$0xff] }
 0x10a   :  { %v1030_v15 = vadd.f32 %v1029_v33, %v999_v35  ;;  %v1251_v25 = vpop.eup %1250  ;;  %v862_v30 = vsel %vm2865_vm13, %v2861_v8, %v856_v58  ;;  %v2932_v42 = vmul.f32 %v3715_v10, %v894_v44  ;;  %v903_v37 = vadd.f32 1.0, %v902_v51  ;;  %v3741_v10 = vld [vmem:[#allocation142_spill] sm:$0xff]  ;;  %v3746_v58 = vld [vmem:[#allocation100_spill] sm:$0xff] }
 0x10b   :  { %v912_v45 = vadd.f32 1.0, %v911_v47  ;;  %vm2934_vm6 = vcmp.lt.f32.partialorder %v905_v53, 0.0004427343  ;;  %1260 = vlog2.f32 %v3737_v34  ;;  %v972_v3 = vadd.f32 %v844_v21, %v3738_v2  ;;  %v3749_v44 = vld [vmem:[#allocation110_spill] sm:$0xff]  ;;  %v3759_v2 = vld [vmem:[#allocation85_spill] sm:$0xff] }
 0x10c   :  { %v1002_v54 = vmul.f32 %v970_v46, %v3739_v19  ;;  %v1031_v62 = vadd.f32 %v1030_v15, %v1000_v13  ;;  %v1253_v40 = vpop.eup %1252  ;;  %v871_v8 = vsel %vm2880_vm14, %v2878_v22, %v865_v28  ;;  %v874_v16 = vmul.f32 0.6931472, %v1249_v4  ;;  %v3752_v13 = vld [vmem:[#allocation116_spill] sm:$0xff]  ;;  %v3760_v19 = vld [vmem:[#allocation111_spill] sm:$0xff] }
 0x10d   :  { %v914_v63 = vand.u32 2147483647, %v3724_v5  ;;  %v920_v48 = vmul.f32 -0.5, %v3740_v9  ;;  %1262 = vlog2.f32 %v3741_v10  ;;  %v973_v61 = vadd.f32 %v853_v14, %v3742_v43  ;;  %v3753_v14 = vld [vmem:[#allocation24_spill] sm:$0xff] }
 0x10e   :  { %v1003_v59 = vmul.f32 %v971_v1, %v3743_v57  ;;  %v1032_v21 = vadd.f32 %v1031_v62, %v1001_v52  ;;  %v1255_v38 = vpop.eup %1254  ;;  %v883_v20 = vmul.f32 0.6931472, %v1251_v25  ;;  %v904_v12 = vmul.f32 %v3723_v29, %v903_v37  ;;  %v3757_v1 = vld [vmem:[#allocation106_spill] sm:$0xff]  ;;  %v3758_v25 = vld [vmem:[#allocation120_spill] sm:$0xff] }
 0x10f   :  { %v913_v26 = vmul.f32 %v3724_v5, %v912_v45  ;;  %v923_v22 = vand.u32 2147483647, %v3740_v9  ;;  %1264 = vlog2.f32 %v3744_v50  ;;  %v974_v23 = vadd.f32 %v862_v30, %v3745_v56  ;;  %v3750_v5 = vld [vmem:[#allocation84_spill] sm:$0xff]  ;;  %v1283_v45 = vld [vmem:[#allocation5 + $0xe8] sm:$0xff] }
 0x110   :  { %v1004_v6 = vmul.f32 %v972_v3, %v3746_v58  ;;  %v1033_v55 = vadd.f32 %v1032_v21, %v1002_v54  ;;  %v880_v36 = vsel %vm2899_vm15, %v2895_v18, %v874_v16  ;;  %v892_v35 = vmul.f32 0.6931472, %v1253_v40  ;;  %v3766_v50 = vld [vmem:[#allocation51_spill] sm:$0xff]  ;;  %v3767_v58 = vld [vmem:[#allocation32_spill] sm:$0xff] }
 0x111   :  { %vm2958_vm7 = vcmp.lt.f32.partialorder %v914_v63, 0.0004427343  ;;  %v929_v29 = vmul.f32 -0.5, %v3749_v44  ;;  %v1257_v51 = vpop.eup %1256  ;;  %v921_v53 = vadd.f32 1.0, %v920_v48  ;;  %v975_v47 = vadd.f32 %v871_v8, %v3750_v5  ;;  %v3763_v48 = vld [vmem:[#allocation18_spill] sm:$0xff] }
 0x112   :  { %v1005_v27 = vmul.f32 %v973_v61, %v3751_v7  ;;  %v1034_v46 = vadd.f32 %v1033_v55, %v1003_v59  ;;  %v889_v49 = vsel %vm2917_vm4, %v2915_v11, %v883_v20  ;;  %v901_v0 = vmul.f32 0.6931472, %v1255_v38  ;;  %v3774_v7 = vld [vmem:[#allocation26_spill] sm:$0xff] }
 0x113   :  { %v932_v18 = vand.u32 2147483647, %v3749_v44  ;;  %v938_v33 = vmul.f32 -0.5, %v3752_v13  ;;  %v1259_v4 = vpop.eup %1258  ;;  %vm533_vm0 = vcmp.gt.f32.partialorder %v3753_v14, 0.0  ;;  %vm2971_vm1 = vcmp.lt.f32.partialorder %v923_v22, 0.0004427343 }
 0x114   :  { %v976_v31 = vadd.f32 %v880_v36, %v3756_v39  ;;  %v1006_v17 = vmul.f32 %v974_v23, %v3757_v1  ;;  %v1035_v52 = vadd.f32 %v1034_v46, %v1004_v6  ;;  %v898_v11 = vsel %vm2921_vm5, %v2932_v42, %v892_v35  ;;  %v3768_v6 = vld [vmem:[#allocation34_spill] sm:$0xff]  ;;  %v3780_v39 = vld [vmem:[#allocation55_spill] sm:$0xff] }
 0x115   :  { %v910_v41 = vmul.f32 0.6931472, %v1257_v51  ;;  %v930_v15 = vadd.f32 1.0, %v929_v29  ;;  %v947_v30 = vmul.f32 -0.5, %v3758_v25  ;;  %v1261_v37 = vpop.eup %1260  ;;  %vm534_vm2 = vcmp.gt.f32.partialorder %v1283_v45, 0.0  ;;  %v3772_v29 = vld [vmem:[#allocation19_spill] sm:$0xff] }
 0x116   :  { %v922_v34 = vmul.f32 %v3740_v9, %v921_v53  ;;  %v977_v3 = vadd.f32 %v889_v49, %v3759_v2  ;;  %v1007_v54 = vmul.f32 %v975_v47, %v3760_v19  ;;  %v1036_v62 = vadd.f32 %v1035_v52, %v1005_v27  ;;  %v3764_v9 = vld [vmem:[#allocation112_spill] sm:$0xff] }
 0x117   :  { %v907_v40 = vsel %vm2934_vm6, %v904_v12, %v901_v0  ;;  %v919_v8 = vmul.f32 0.6931472, %v1259_v4  ;;  %vm2986_vm3 = vcmp.lt.f32.partialorder %v932_v18, 0.0004427343  ;;  %v939_v42 = vadd.f32 1.0, %v938_v33  ;;  %v1263_v16 = vpop.eup %1262  ;;  %v3765_v12 = vld [vmem:[#allocation90_spill] sm:$0xff] }
 0x118   :  { %v941_v63 = vand.u32 2147483647, %v3752_v13  ;;  %v978_v10 = vadd.f32 %v898_v11, %v3763_v48  ;;  %v1008_v43 = vmul.f32 %v976_v31, %v3764_v9  ;;  %v1037_v61 = vadd.f32 %v1036_v62, %v1006_v17  ;;  %v3773_v53 = vld [vmem:[#allocation52_spill] sm:$0xff]  ;;  %v3779_v4 = vld [vmem:[#allocation91_spill] sm:$0xff]  ;;  %v3781_v17 = vld [vmem:[#allocation94_spill] sm:$0xff] }
 0x119   :  { %v916_v57 = vsel %vm2958_vm7, %v913_v26, %v910_v41  ;;  %v928_v59 = vmul.f32 0.6931472, %v1261_v37  ;;  %v931_v32 = vmul.f32 %v3749_v44, %v930_v15  ;;  %v948_v21 = vadd.f32 1.0, %v947_v30  ;;  %v1265_v38 = vpop.eup %1264  ;;  %v3775_v27 = vld [vmem:[#allocation36_spill] sm:$0xff]  ;;  %v1285_v41 = vld [vmem:[#allocation5 + $0xe0] sm:$0xff]  ;;  %v3782_v15 = vld [vmem:[#allocation59_spill] sm:$0xff] }
 0x11a   :  { %v950_v20 = vand.u32 2147483647, %v3758_v25  ;;  %v979_v22 = vadd.f32 %v907_v40, %v3765_v12  ;;  %v1009_v56 = vmul.f32 %v977_v3, %v3766_v50  ;;  %v1038_v23 = vadd.f32 %v1037_v61, %v1007_v54  ;;  %v1284_v11 = vld [vmem:[#allocation5 + $0xf0] sm:$0xff] }
 0x11b   :  { %v3769_v55 = vmax.f32 %v3768_v6, 0.0  ;;  %v925_v35 = vsel %vm2971_vm1, %v922_v34, %v919_v8  ;;  %v937_v26 = vmul.f32 0.6931472, %v1263_v16  ;;  %v940_v60 = vmul.f32 %v3752_v13, %v939_v42  ;;  %v3783_v37 = vld [vmem:[#allocation28_spill] sm:$0xff]  ;;  %v3784_v34 = vld [vmem:[#allocation38_spill] sm:$0xff] }
 0x11c   :  { %vm3005_vm8 = vcmp.lt.f32.partialorder %v941_v63, 0.0004427343  ;;  %v980_v51 = vadd.f32 %v916_v57, %v3772_v29  ;;  %v1010_v5 = vmul.f32 %v978_v10, %v3773_v53  ;;  %v1039_v47 = vadd.f32 %v1038_v23, %v1008_v43  ;;  %v3786_v54 = vld [vmem:[#allocation144_spill] sm:$0xff]  ;;  %v1286_v63 = vld [vmem:[#allocation5 + $0xf8] sm:$0xff] }
 0x11d   :  { %v662_v36 = vsub.f32 %v3769_v55, %v3767_v58  ;;  %v3776_v46 = vmax.f32 %v3775_v27, 0.0  ;;  %v934_v0 = vsel %vm2986_vm3, %v931_v32, %v928_v59  ;;  %v946_v18 = vmul.f32 0.6931472, %v1265_v38  ;;  %v3787_v8 = vld [vmem:[#allocation56_spill] sm:$0xff] }
 0x11e   :  { %v949_v33 = vmul.f32 %v3758_v25, %v948_v21  ;;  %vm3017_vm9 = vcmp.lt.f32.partialorder %v950_v20, 0.0004427343  ;;  %v981_v28 = vadd.f32 %v925_v35, %v3779_v4  ;;  %v1011_v31 = vmul.f32 %v979_v22, %v3780_v39  ;;  %v3788_v42 = vld [vmem:[#allocation60_spill] sm:$0xff] }
 0x11f   :  { %v663_v49 = vsub.f32 %v3776_v46, %v3774_v7  ;;  %v1040_v1 = vadd.f32 %v1039_v47, %v1009_v56  ;;  %v503_v52 = vmul.f32 0.75, %v3781_v17  ;;  %vm535_vm10 = vcmp.gt.f32.partialorder %v1284_v11, 0.0 }
 0x120   :  { %v565_v30 = vsel %vm533_vm0, %v1285_v41, %v3782_v15  ;;  %v943_v25 = vsel %vm3005_vm8, %v940_v60, %v937_v26  ;;  %v3785_v2 = vmax.f32 %v3784_v34, 0.0  ;;  %v982_v19 = vadd.f32 %v934_v0, %v662_v36 }
 0x121   :  { %v1012_v62 = vmul.f32 %v980_v51, %v3786_v54  ;;  %v1041_v40 = vadd.f32 %v1040_v1, %v1010_v5  ;;  %v504_v24 = vmul.f32 0.75, %v3787_v8  ;;  %v566_v16 = vsel %vm534_vm2, %v1283_v45, %v3788_v42 }
 0x122   :  { %v664_v3 = vsub.f32 %v3785_v2, %v3783_v37  ;;  %v952_v14 = vsel %vm3017_vm9, %v949_v33, %v946_v18  ;;  %vm536_vm11 = vcmp.gt.f32.partialorder %v1286_v63, 0.0  ;;  %v983_v48 = vadd.f32 %v943_v25, %v663_v49 }
 0x123   :  { %v1013_v10 = vmul.f32 %v981_v28, %v565_v30  ;;  %v1042_v9 = vadd.f32 %v1041_v40, %v1011_v31  ;;  %v567_v43 = vsel %vm535_vm10, %v1284_v11, %v503_v52  ;;  %v1014_v57 = vmul.f32 %v982_v19, %v566_v16 }
 0x124   :  { %v984_v61 = vadd.f32 %v952_v14, %v664_v3  ;;  %v568_v32 = vsel %vm536_vm11, %v1286_v63, %v504_v24  ;;  %v1015_v21 = vmul.f32 %v983_v48, %v567_v43 }
 0x125   :  { %v1043_v59 = vadd.f32 %v1042_v9, %v1012_v62 }
 0x126   :  { %v1016_v20 = vmul.f32 %v984_v61, %v568_v32 }
 0x127   :  { %v1044_v38 = vadd.f32 %v1043_v59, %v1013_v10 }
 0x129   :  { %v1045_v12 = vadd.f32 %v1044_v38, %v1014_v57 }
 0x12b   :  { %v1046_v22 = vadd.f32 %v1045_v12, %v1015_v21 }
 0x12d   :  { %v1047_v45 = vadd.f32 %v1046_v22, %v1016_v20 }
 0x12f   :  { %1051 = vst [vmem:[#allocation7] sm:$0xff] %v1047_v45 }
 0x130   :  { %1342 = shalt.err (!%p1339_p6)
}
 0x131   :  { %s1343_s10 = scalar_lea.hbm %s3053_s2, 128 }
 0x132   :  { %p1344_p7 = scmp.ne.s32.totalorder %s3053_s2, %s1343_s10  ;;  %p1347_p8 = scmp.lt.u32.totalorder %s1343_s10, %s3053_s2 }
 0x134   :  { %p1349_p9 = pnand %p1347_p8, %p1344_p7 }
 0x136   :  { %1352 = shalt.err (!%p1349_p9)
}
 0x137   :  { %1061 = dma.vmem_to_hbm [thread:$0]  %s1059_s6, 128, %s3053_s2, [#allocation4]  }
 0x138   :  { %1357 = dma.done.wait [#allocation4], 128  }
 0x139   :  { %1358 = vsyncadd [#allocation4], 4294967168 }
 0x13a   :  { %1065 = vsyncpa [#allocation3], 1 }
 0x13b   :  { %1066 = vsyncpa [#allocation6], 1 }
 0x13c   :  { %1067 = vsyncpa [#allocation4], 1 }

</bundles_post_ra>
